<compile_context>
chip_gen: v6e
topology: v6e:2x2x1
jax: 0.10.0
libtpu: 0.0.40
codegen_flags: <defaults>
</compile_context>

<pallas_src>
import math

import jax
import jax.numpy as jnp
from jax.experimental import pallas as pl
from jax.experimental.pallas import tpu as pltpu


# mini-EfficientNet channel plan (scaled-down B0-style)
C_IN, C_STEM, C_EXP, C_SE, C_BLOCK, C_HEAD = 3, 32, 128, 8, 32, 128
K_STEM_RAW = 9 * C_IN      # 27
K_STEM = 32                # padded to an aligned lane count


def _pick_block(m, preferred=(2048, 1024, 512, 256, 128, 64, 32)):
    """Largest row-block from the preferred list that divides m (bigger tiles amortize
    the ~0.35us/step overhead on v5e/v6e; footprints stay tiny at these widths)."""
    for bm in preferred:
        if bm <= m and m % bm == 0:
            return bm
    # TODO(synk): masked tail handling for ragged M at real resolutions.
    return m


def _pick_rows(ho, preferred=(64, 32, 16, 8, 4, 2, 1)):
    """Spatial row-block for the depthwise kernel (keeps halo tiles far under v7x VMEM)."""
    for bh in preferred:
        if bh <= ho and ho % bh == 0:
            return bh
    return ho


def _vmem_budget(block_specs, cap=56 << 20, floor=32 << 20):
    """Per-kernel vmem_limit_bytes from actual block footprints (double-buffered pipeline
    + headroom for in-kernel f32 temporaries), capped under v7x's 64 MiB/TC."""
    per_step = sum(math.prod(s) * jnp.dtype(d).itemsize for s, d in block_specs)
    return int(min(cap, max(floor, 4 * per_step)))


# ---------------------------------------------------------------------------
# Kernel A: stem conv (+folded BN, SiLU) + 1x1 expand (+folded BN, SiLU)
#           + residual pre-projection through the (folded) head weight.
# All three outputs/intermediates that reach HBM are 128-lane dense bf16.
# ---------------------------------------------------------------------------
def _stem_expand_kernel(cols_ref, ws_ref, bs_ref, we_ref, be_ref, wr_ref,
                        h_ref, r_ref):
    # stem conv-as-matmul (K padded 27 -> 32); BN scale already folded into ws.
    y = jnp.dot(cols_ref[...], ws_ref[...], preferred_element_type=jnp.float32)
    y = y + bs_ref[...]
    y = y * jax.nn.sigmoid(y)                       # SiLU in f32 (v5e-safe)
    yb = y.astype(jnp.bfloat16)                     # MXU operand, stays in vregs
    # 1x1 expand (BN scale folded into we)
    h = jnp.dot(yb, we_ref[...], preferred_element_type=jnp.float32) + be_ref[...]
    h = h * jax.nn.sigmoid(h)
    h_ref[...] = h.astype(h_ref.dtype)              # bf16 to HBM
    # residual pre-projected through the folded head weight: r_head = y_stem @ (wh*sh).
    # This removes every 32-lane HBM path (lane-dense store here, lane-dense load in D).
    r_ref[...] = jnp.dot(yb, wr_ref[...],
                         preferred_element_type=jnp.float32).astype(r_ref.dtype)


def stem_expand_res(cols, ws, bs, we, be, wr):
    M, K = cols.shape
    bm = _pick_block(M)
    blocks = [((bm, K), cols.dtype), ((K, C_STEM), ws.dtype), ((1, C_STEM), jnp.float32),
              ((C_STEM, C_EXP), we.dtype), ((1, C_EXP), jnp.float32),
              ((C_BLOCK, C_HEAD), wr.dtype),
              ((bm, C_EXP), jnp.bfloat16), ((bm, C_HEAD), jnp.bfloat16)]
    return pl.pallas_call(
        _stem_expand_kernel,
        out_shape=(jax.ShapeDtypeStruct((M, C_EXP), jnp.bfloat16),
                   jax.ShapeDtypeStruct((M, C_HEAD), jnp.bfloat16)),
        grid=(M // bm,),
        in_specs=[
            pl.BlockSpec((bm, K), lambda i: (i, 0)),
            pl.BlockSpec((K, C_STEM), lambda i: (0, 0)),
            pl.BlockSpec((1, C_STEM), lambda i: (0, 0)),
            pl.BlockSpec((C_STEM, C_EXP), lambda i: (0, 0)),
            pl.BlockSpec((1, C_EXP), lambda i: (0, 0)),
            pl.BlockSpec((C_BLOCK, C_HEAD), lambda i: (0, 0)),
        ],
        out_specs=(pl.BlockSpec((bm, C_EXP), lambda i: (i, 0)),
                   pl.BlockSpec((bm, C_HEAD), lambda i: (i, 0))),
        compiler_params=pltpu.CompilerParams(
            dimension_semantics=("parallel",),
            vmem_limit_bytes=_vmem_budget(blocks)),
    )(cols, ws, bs.reshape(1, -1), we, be.reshape(1, -1), wr)


# ---------------------------------------------------------------------------
# Kernel B: depthwise 3x3 (+folded BN, SiLU), spatially tiled with halo row blocks,
#           with the SE global-average-pool fused as a second (N, 1, C) output
#           accumulated across the spatial grid axis.
# ---------------------------------------------------------------------------
def _dw_pool_kernel(x_ref, w_ref, b_ref, o_ref, pool_ref):
    bh, wo = o_ref.shape[1], o_ref.shape[2]
    x = x_ref[0].astype(jnp.float32)                # one bf16->f32 upcast of the halo tile
    w = w_ref[...]                                  # (9, C) f32, BN scale pre-folded
    acc = None
    # only 3 sublane-shifted copies (one per dj), reused across the 3 row offsets.
    for dj in range(3):
        xj = x[:, dj:dj + wo, :]                    # sublane shift (XLU), 3 total not 9
        for di in range(3):
            term = xj[di:di + bh] * w[di * 3 + dj][None, None, :]   # leading-axis slice: cheap
            acc = term if acc is None else acc + term
    y = acc + b_ref[0][None, None, :]
    y = y * jax.nn.sigmoid(y)                       # SiLU in f32 (v5e-safe VPU/EUP)
    o_ref[0] = y.astype(o_ref.dtype)                # bf16 to HBM

    # fused global-average-pool: partial sums accumulated across the row-block axis.
    @pl.when(pl.program_id(1) == 0)
    def _():
        pool_ref[...] = jnp.zeros_like(pool_ref)
    pool_ref[...] += jnp.sum(y, axis=(0, 1)).reshape(1, 1, -1)


def depthwise3x3_pool(h_nhwc, w, b):
    n, ho, wo, c = h_nhwc.shape
    bh = _pick_rows(ho)
    nhb = ho // bh
    wp = wo + 2
    xpad = jnp.pad(h_nhwc, ((0, 0), (1, 1), (1, 1), (0, 0)))     # pad=1 halo
    # Row blocks carry their own 1-row halos (duplicated in HBM: 2/bh overhead).
    # TODO(synk): switch to an overlapping-window BlockSpec / manual halo DMA to drop the
    #             duplication entirely at production resolutions.
    xb = jnp.concatenate(
        [xpad[:, j * bh:j * bh + bh + 2][:, None] for j in range(nhb)], axis=1)
    xb = xb.reshape(n * nhb, bh + 2, wp, c)

    blocks = [((1, bh + 2, wp, c), xb.dtype), ((9, c), jnp.float32), ((1, c), jnp.float32),
              ((1, bh, wo, c), jnp.bfloat16), ((1, 1, c), jnp.float32),
              ((bh + 2, wp, c), jnp.float32)]      # include the in-kernel f32 upcast temp
    return pl.pallas_call(
        _dw_pool_kernel,
        out_shape=(jax.ShapeDtypeStruct((n, ho, wo, c), jnp.bfloat16),
                   jax.ShapeDtypeStruct((n, 1, c), jnp.float32)),
        grid=(n, nhb),
        in_specs=[
            pl.BlockSpec((1, bh + 2, wp, c), lambda i, j: (i * nhb + j, 0, 0, 0)),
            pl.BlockSpec((9, c), lambda i, j: (0, 0)),
            pl.BlockSpec((1, c), lambda i, j: (0, 0)),
        ],
        out_specs=(pl.BlockSpec((1, bh, wo, c), lambda i, j: (i, j, 0, 0)),
                   pl.BlockSpec((1, 1, c), lambda i, j: (i, 0, 0))),
        compiler_params=pltpu.CompilerParams(
            dimension_semantics=("parallel", "arbitrary"),
            vmem_limit_bytes=_vmem_budget(blocks)),
    )(xb, w, b.reshape(1, -1))


# ---------------------------------------------------------------------------
# Kernel C: squeeze-excitation gate on the pre-pooled (N, C_EXP) vector only
# (the pooling itself now lives in kernel B, so no activation re-read from HBM).
# ---------------------------------------------------------------------------
def _se_gate_kernel(p_ref, w1_ref, b1_ref, w2_ref, b2_ref, g_ref):
    s1 = jnp.dot(p_ref[...].astype(jnp.bfloat16), w1_ref[...],
                 preferred_element_type=jnp.float32) + b1_ref[...]
    s1 = s1 * jax.nn.sigmoid(s1)                                  # (N, C_SE)
    g = jnp.dot(s1.astype(jnp.bfloat16), w2_ref[...],
                preferred_element_type=jnp.float32) + b2_ref[...]
    g_ref[...] = jax.nn.sigmoid(g)                                # (N, C_EXP)


def se_gate(pooled, w1, b1, w2, b2):
    n, c = pooled.shape
    return pl.pallas_call(
        _se_gate_kernel,
        out_shape=jax.ShapeDtypeStruct((n, c), jnp.float32),
    )(pooled, w1, b1.reshape(1, -1), w2, b2.reshape(1, -1))


# ---------------------------------------------------------------------------
# Kernel D: SE channel-scale + fused (project∘head) matmul + residual + bias + SiLU.
# W_big = (pw*ps)@(wh*sh) is a single 128x128 bf16 weight; the residual arrives already
# head-projected from kernel A, so no 32-lane intermediate exists anywhere.
# ---------------------------------------------------------------------------
def _gate_head_kernel(h_ref, g_ref, r_ref, w_ref, b_ref, o_ref):
    hg = h_ref[0].astype(jnp.float32) * g_ref[0]                  # (bhw, C_EXP) * (1, C_EXP)
    acc = jnp.dot(hg.astype(jnp.bfloat16), w_ref[...],
                  preferred_element_type=jnp.float32)
    acc = acc + r_ref[0].astype(jnp.float32) + b_ref[...]
    acc = acc * jax.nn.sigmoid(acc)
    o_ref[0] = acc.astype(o_ref.dtype)


def gate_head(h3, gate3, r3, w_big, b_fused):
    n, hw_sp, _ = h3.shape
    bhw = _pick_block(hw_sp)
    blocks = [((1, bhw, C_EXP), h3.dtype), ((1, 1, C_EXP), jnp.float32),
              ((1, bhw, C_HEAD), r3.dtype), ((C_EXP, C_HEAD), w_big.dtype),
              ((1, C_HEAD), jnp.float32), ((1, bhw, C_HEAD), jnp.float32)]
    return pl.pallas_call(
        _gate_head_kernel,
        out_shape=jax.ShapeDtypeStruct((n, hw_sp, C_HEAD), jnp.float32),
        grid=(n, hw_sp // bhw),
        in_specs=[
            pl.BlockSpec((1, bhw, C_EXP), lambda i, j: (i, j, 0)),
            pl.BlockSpec((1, 1, C_EXP), lambda i, j: (i, 0, 0)),
            pl.BlockSpec((1, bhw, C_HEAD), lambda i, j: (i, j, 0)),
            pl.BlockSpec((C_EXP, C_HEAD), lambda i, j: (0, 0)),
            pl.BlockSpec((1, C_HEAD), lambda i, j: (0, 0)),
        ],
        out_specs=pl.BlockSpec((1, bhw, C_HEAD), lambda i, j: (i, j, 0)),
        compiler_params=pltpu.CompilerParams(
            dimension_semantics=("parallel", "parallel"),
            vmem_limit_bytes=_vmem_budget(blocks)),
    )(h3, gate3, r3, w_big, b_fused.reshape(1, -1))


# ---------------------------------------------------------------------------
# Glue: stem im2col (bf16), folded-parameter construction, forward pass
# ---------------------------------------------------------------------------
def _im2col(x, k, stride, pad):
    """x: (N, H, W, C) -> patches (N, Ho, Wo, k*k, C)."""
    x = jnp.pad(x, ((0, 0), (pad, pad), (pad, pad), (0, 0)))
    N, H, W, C = x.shape
    Ho = (H - k) // stride + 1
    Wo = (W - k) // stride + 1
    taps = []
    for di in range(k):
        for dj in range(k):
            taps.append(
                x[:, di:di + stride * (Ho - 1) + 1:stride,
                  dj:dj + stride * (Wo - 1) + 1:stride, :])
    p = jnp.stack(taps, axis=3)
    return p, (N, Ho, Wo)


def _bn_fold(key, c, eps=1e-3):
    k1, k2, k3, k4 = jax.random.split(key, 4)
    gamma = 1.0 + 0.1 * jax.random.normal(k1, (c,))
    beta = 0.1 * jax.random.normal(k2, (c,))
    mean = 0.05 * jax.random.normal(k3, (c,))
    var = 0.9 + 0.1 * jnp.abs(jax.random.normal(k4, (c,)))
    scale = gamma / jnp.sqrt(var + eps)
    return scale.astype(jnp.float32), (beta - mean * scale).astype(jnp.float32)


def init_params(key):
    ks = jax.random.split(key, 16)
    p = {}
    # stem: Conv2d(3, 32, 3, stride=2, padding=1, bias=False) + BN + SiLU (scale folded)
    w = 0.1 * jax.random.normal(ks[0], (C_STEM, C_IN, 3, 3))
    w = jnp.transpose(w, (2, 3, 1, 0)).reshape(K_STEM_RAW, C_STEM)
    ss, sb = _bn_fold(ks[1], C_STEM)
    w = w * ss[None, :]
    p["stem_w"] = jnp.pad(w, ((0, K_STEM - K_STEM_RAW), (0, 0))).astype(jnp.bfloat16)
    p["stem_b"] = sb
    # expand: Conv2d(32, 128, 1, bias=False) + BN + SiLU (scale folded)
    w = 0.1 * jax.random.normal(ks[2], (C_EXP, C_STEM, 1, 1))[:, :, 0, 0].T
    es, eb = _bn_fold(ks[3], C_EXP)
    p["exp_w"] = (w * es[None, :]).astype(jnp.bfloat16)
    p["exp_b"] = eb
    # depthwise: Conv2d(128, 128, 3, groups=128, padding=1, bias=False) + BN + SiLU
    w = 0.1 * jax.random.normal(ks[4], (C_EXP, 1, 3, 3))
    w = jnp.transpose(w, (2, 3, 1, 0)).reshape(9, C_EXP)
    ds_, db_ = _bn_fold(ks[5], C_EXP)
    p["dw_w"] = (w * ds_[None, :]).astype(jnp.float32)     # f32: VPU path (v5e-safe)
    p["dw_b"] = db_
    # SqueezeExcitation: Conv2d(128, 8, 1)+SiLU, Conv2d(8, 128, 1)+Sigmoid (with bias)
    p["se1_w"] = (0.1 * jax.random.normal(ks[6], (C_SE, C_EXP, 1, 1))[:, :, 0, 0].T
                  ).astype(jnp.bfloat16)
    p["se1_b"] = (0.05 * jax.random.normal(ks[7], (C_SE,))).astype(jnp.float32)
    p["se2_w"] = (0.1 * jax.random.normal(ks[8], (C_EXP, C_SE, 1, 1))[:, :, 0, 0].T
                  ).astype(jnp.bfloat16)
    p["se2_b"] = (0.05 * jax.random.normal(ks[9], (C_EXP,))).astype(jnp.float32)
    # project Conv2d(128,32,1)+BN and head Conv2d(32,128,1)+BN+SiLU, folded algebraically:
    #   out_pre = hg @ (pw') @ (wh') + pb @ wh' + y_stem @ wh' + bh,  pw'=pw*ps, wh'=wh*sh
    pw = 0.1 * jax.random.normal(ks[10], (C_BLOCK, C_EXP, 1, 1))[:, :, 0, 0].T   # (C_EXP, C_BLOCK)
    ps_, pb_ = _bn_fold(ks[11], C_BLOCK)
    wh = 0.1 * jax.random.normal(ks[12], (C_HEAD, C_BLOCK, 1, 1))[:, :, 0, 0].T  # (C_BLOCK, C_HEAD)
    hs_, hb_ = _bn_fold(ks[13], C_HEAD)
    pw_f = pw * ps_[None, :]
    wh_f = wh * hs_[None, :]
    p["big_w"] = (pw_f @ wh_f).astype(jnp.bfloat16)          # (C_EXP, C_HEAD) fused weight
    p["res_w"] = wh_f.astype(jnp.bfloat16)                   # (C_BLOCK, C_HEAD) residual proj
    p["fused_b"] = (pb_ @ wh_f + hb_).astype(jnp.float32)    # (C_HEAD,)
    return p


@jax.jit
def efficientnet_features(x_nchw, params):
    """Equivalent of `self._model.features(input)` for the mini config above."""
    x = jnp.transpose(x_nchw, (0, 2, 3, 1))                         # NCHW -> NHWC

    # stem im2col built directly in bf16 (K padded 27 -> 32 for aligned MXU lanes)
    # TODO(synk): at 224x224 the stem im2col should move in-kernel (halo'd spatial
    #             BlockSpec) to avoid the 9x HBM blow-up of the 3-channel input.
    patches, (n, ho, wo) = _im2col(x.astype(jnp.bfloat16), k=3, stride=2, pad=1)
    m = n * ho * wo
    cols = patches.reshape(m, K_STEM_RAW)
    cols = jnp.pad(cols, ((0, 0), (0, K_STEM - K_STEM_RAW)))

    # A) stem conv + 1x1 expand + residual pre-projection (all BN scales folded)
    h, r_head = stem_expand_res(cols, params["stem_w"], params["stem_b"],
                                params["exp_w"], params["exp_b"], params["res_w"])

    # B) depthwise 3x3 s1 (+BN+SiLU) with fused global-average-pool, spatially tiled
    h_dw, pool_sum = depthwise3x3_pool(h.reshape(n, ho, wo, C_EXP),
                                       params["dw_w"], params["dw_b"])

    # C) squeeze-excitation gate on the tiny pooled vector only
    pooled_mean = pool_sum[:, 0, :] * (1.0 / float(ho * wo))        # (N, C_EXP)
    gate = se_gate(pooled_mean, params["se1_w"], params["se1_b"],
                   params["se2_w"], params["se2_b"])                # (N, C_EXP)

    # D) SE scale + fused (project∘head) matmul + residual + SiLU
    out3 = gate_head(h_dw.reshape(n, ho * wo, C_EXP),
                     gate.reshape(n, 1, C_EXP),
                     r_head.reshape(n, ho * wo, C_HEAD),
                     params["big_w"], params["fused_b"])

    out = out3.reshape(n, ho, wo, C_HEAD)
    return jnp.transpose(out, (0, 3, 1, 2))                         # NHWC -> NCHW


if __name__ == "__main__":
    key = jax.random.PRNGKey(0)
    pkey, xkey = jax.random.split(key)
    params = init_params(pkey)
    x = jax.random.normal(xkey, (2, 3, 16, 16), dtype=jnp.float32)  # NCHW like PyTorch
    out = efficientnet_features(x, params)
    jax.block_until_ready(out)
    assert out.shape == (2, C_HEAD, 8, 8), out.shape
    assert out.dtype == jnp.float32
    assert bool(jnp.isfinite(out).all())
    print("KERNEL_OK")
</pallas_src>

<mosaic_0001>
module attributes {stable_mosaic.version = 11 : i64} {
  func.func @_stem_expand_kernel(%arg0: i32, %arg1: memref<128x32xbf16, #tpu.memory_space<vmem>>, %arg2: memref<32x32xbf16, #tpu.memory_space<vmem>>, %arg3: memref<1x32xf32, #tpu.memory_space<vmem>>, %arg4: memref<32x128xbf16, #tpu.memory_space<vmem>>, %arg5: memref<1x128xf32, #tpu.memory_space<vmem>>, %arg6: memref<32x128xbf16, #tpu.memory_space<vmem>>, %arg7: memref<128x128xbf16, #tpu.memory_space<vmem>>, %arg8: memref<128x128xbf16, #tpu.memory_space<vmem>>) attributes {dimension_semantics = [#tpu.dimension_semantics<parallel>], iteration_bounds = array<i64: 1>, scalar_prefetch = 0 : i64, scratch_operands = 0 : i64, tpu.core_type = #tpu.core_type<tc>, window_params = [{transform_indices = @transform_0, window_bounds = array<i64: 128, 32>}, {pipeline_mode = #tpu.pipeline_mode<synchronous>, transform_indices = @transform_1, window_bounds = array<i64: 32, 32>}, {pipeline_mode = #tpu.pipeline_mode<synchronous>, transform_indices = @transform_2, window_bounds = array<i64: 1, 32>}, {pipeline_mode = #tpu.pipeline_mode<synchronous>, transform_indices = @transform_3, window_bounds = array<i64: 32, 128>}, {pipeline_mode = #tpu.pipeline_mode<synchronous>, transform_indices = @transform_4, window_bounds = array<i64: 1, 128>}, {pipeline_mode = #tpu.pipeline_mode<synchronous>, transform_indices = @transform_5, window_bounds = array<i64: 32, 128>}, {transform_indices = @transform_6, window_bounds = array<i64: 128, 128>}, {transform_indices = @transform_7, window_bounds = array<i64: 128, 128>}]} {
    %c0 = arith.constant 0 : index
    %c0_0 = arith.constant 0 : index
    %0 = vector.load %arg1[%c0, %c0_0] : memref<128x32xbf16, #tpu.memory_space<vmem>>, vector<128x32xbf16>
    %c0_1 = arith.constant 0 : index
    %c0_2 = arith.constant 0 : index
    %1 = vector.load %arg2[%c0_1, %c0_2] : memref<32x32xbf16, #tpu.memory_space<vmem>>, vector<32x32xbf16>
    %cst = arith.constant dense<0.000000e+00> : vector<128x32xf32>
    %2 = tpu.matmul %0, %1, %cst {dimension_numbers = #tpu.dot_dimension_numbers<[1], [0], [0], [1], [0, 0, 1, 1], [], []>} : vector<128x32xbf16>, vector<32x32xbf16>, vector<128x32xf32> -> vector<128x32xf32>
    %c0_3 = arith.constant 0 : index
    %c0_4 = arith.constant 0 : index
    %3 = vector.load %arg3[%c0_3, %c0_4] : memref<1x32xf32, #tpu.memory_space<vmem>>, vector<1x32xf32>
    %4 = vector.broadcast %3 : vector<1x32xf32> to vector<128x32xf32>
    %5 = arith.addf %2, %4 : vector<128x32xf32>
    %6 = arith.negf %5 : vector<128x32xf32>
    %7 = math.exp %6 : vector<128x32xf32>
    %cst_5 = arith.constant 1.000000e+00 : f32
    %8 = vector.broadcast %cst_5 : f32 to vector<128x32xf32>
    %9 = arith.addf %8, %7 : vector<128x32xf32>
    %10 = arith.divf %8, %9 : vector<128x32xf32>
    %11 = arith.mulf %5, %10 : vector<128x32xf32>
    %12 = arith.truncf %11 : vector<128x32xf32> to vector<128x32xbf16>
    %c0_6 = arith.constant 0 : index
    %c0_7 = arith.constant 0 : index
    %13 = vector.load %arg4[%c0_6, %c0_7] : memref<32x128xbf16, #tpu.memory_space<vmem>>, vector<32x128xbf16>
    %cst_8 = arith.constant dense<0.000000e+00> : vector<128x128xf32>
    %14 = tpu.matmul %12, %13, %cst_8 {dimension_numbers = #tpu.dot_dimension_numbers<[1], [0], [0], [1], [0, 0, 1, 1], [], []>} : vector<128x32xbf16>, vector<32x128xbf16>, vector<128x128xf32> -> vector<128x128xf32>
    %c0_9 = arith.constant 0 : index
    %c0_10 = arith.constant 0 : index
    %15 = vector.load %arg5[%c0_9, %c0_10] : memref<1x128xf32, #tpu.memory_space<vmem>>, vector<1x128xf32>
    %16 = vector.broadcast %15 : vector<1x128xf32> to vector<128x128xf32>
    %17 = arith.addf %14, %16 : vector<128x128xf32>
    %18 = arith.negf %17 : vector<128x128xf32>
    %19 = math.exp %18 : vector<128x128xf32>
    %cst_11 = arith.constant 1.000000e+00 : f32
    %20 = vector.broadcast %cst_11 : f32 to vector<128x128xf32>
    %21 = arith.addf %20, %19 : vector<128x128xf32>
    %22 = arith.divf %20, %21 : vector<128x128xf32>
    %23 = arith.mulf %17, %22 : vector<128x128xf32>
    %24 = arith.truncf %23 : vector<128x128xf32> to vector<128x128xbf16>
    %c0_12 = arith.constant 0 : index
    %c0_13 = arith.constant 0 : index
    %25 = vector.load %arg7[%c0_12, %c0_13] : memref<128x128xbf16, #tpu.memory_space<vmem>>, vector<128x128xbf16>
    tpu.vector_store %arg7[%c0_12, %c0_13], %24 {strides = array<i32>} : memref<128x128xbf16, #tpu.memory_space<vmem>>, vector<128x128xbf16>,
    %c0_14 = arith.constant 0 : index
    %c0_15 = arith.constant 0 : index
    %26 = vector.load %arg6[%c0_14, %c0_15] : memref<32x128xbf16, #tpu.memory_space<vmem>>, vector<32x128xbf16>
    %cst_16 = arith.constant dense<0.000000e+00> : vector<128x128xf32>
    %27 = tpu.matmul %12, %26, %cst_16 {dimension_numbers = #tpu.dot_dimension_numbers<[1], [0], [0], [1], [0, 0, 1, 1], [], []>} : vector<128x32xbf16>, vector<32x128xbf16>, vector<128x128xf32> -> vector<128x128xf32>
    %28 = arith.truncf %27 : vector<128x128xf32> to vector<128x128xbf16>
    %c0_17 = arith.constant 0 : index
    %c0_18 = arith.constant 0 : index
    %29 = vector.load %arg8[%c0_17, %c0_18] : memref<128x128xbf16, #tpu.memory_space<vmem>>, vector<128x128xbf16>
    tpu.vector_store %arg8[%c0_17, %c0_18], %28 {strides = array<i32>} : memref<128x128xbf16, #tpu.memory_space<vmem>>, vector<128x128xbf16>,
    return
  }
  func.func @transform_0(%arg0: i32) -> (i32, i32) {
    %c0_i32 = arith.constant 0 : i32
    %c0_i32_0 = arith.constant 0 : i32
    return %arg0, %c0_i32 : i32, i32
  }
  func.func @transform_1(%arg0: i32) -> (i32, i32) {
    %c0_i32 = arith.constant 0 : i32
    %c0_i32_0 = arith.constant 0 : i32
    %c0_i32_1 = arith.constant 0 : i32
    return %c0_i32, %c0_i32_0 : i32, i32
  }
  func.func @transform_2(%arg0: i32) -> (i32, i32) {
    %c0_i32 = arith.constant 0 : i32
    %c0_i32_0 = arith.constant 0 : i32
    %c0_i32_1 = arith.constant 0 : i32
    return %c0_i32, %c0_i32_0 : i32, i32
  }
  func.func @transform_3(%arg0: i32) -> (i32, i32) {
    %c0_i32 = arith.constant 0 : i32
    %c0_i32_0 = arith.constant 0 : i32
    %c0_i32_1 = arith.constant 0 : i32
    return %c0_i32, %c0_i32_0 : i32, i32
  }
  func.func @transform_4(%arg0: i32) -> (i32, i32) {
    %c0_i32 = arith.constant 0 : i32
    %c0_i32_0 = arith.constant 0 : i32
    %c0_i32_1 = arith.constant 0 : i32
    return %c0_i32, %c0_i32_0 : i32, i32
  }
  func.func @transform_5(%arg0: i32) -> (i32, i32) {
    %c0_i32 = arith.constant 0 : i32
    %c0_i32_0 = arith.constant 0 : i32
    %c0_i32_1 = arith.constant 0 : i32
    return %c0_i32, %c0_i32_0 : i32, i32
  }
  func.func @transform_6(%arg0: i32) -> (i32, i32) {
    %c0_i32 = arith.constant 0 : i32
    %c0_i32_0 = arith.constant 0 : i32
    return %arg0, %c0_i32 : i32, i32
  }
  func.func @transform_7(%arg0: i32) -> (i32, i32) {
    %c0_i32 = arith.constant 0 : i32
    %c0_i32_0 = arith.constant 0 : i32
    return %arg0, %c0_i32 : i32, i32
  }
}

module attributes {stable_mosaic.version = 11 : i64} {
  func.func @_dw_pool_kernel(%arg0: i32, %arg1: i32, %arg2: memref<1x10x10x128xbf16, #tpu.memory_space<vmem>>, %arg3: memref<9x128xf32, #tpu.memory_space<vmem>>, %arg4: memref<1x128xf32, #tpu.memory_space<vmem>>, %arg5: memref<1x8x8x128xbf16, #tpu.memory_space<vmem>>, %arg6: memref<1x1x128xf32, #tpu.memory_space<vmem>>) attributes {dimension_semantics = [#tpu.dimension_semantics<parallel>, #tpu.dimension_semantics<arbitrary>], iteration_bounds = array<i64: 2, 1>, scalar_prefetch = 0 : i64, scratch_operands = 0 : i64, tpu.core_type = #tpu.core_type<tc>, window_params = [{transform_indices = @transform_0, window_bounds = array<i64: 1, 10, 10, 128>}, {pipeline_mode = #tpu.pipeline_mode<synchronous>, transform_indices = @transform_1, window_bounds = array<i64: 9, 128>}, {pipeline_mode = #tpu.pipeline_mode<synchronous>, transform_indices = @transform_2, window_bounds = array<i64: 1, 128>}, {transform_indices = @transform_3, window_bounds = array<i64: 1, 8, 8, 128>}, {transform_indices = @transform_4, window_bounds = array<i64: 1, 1, 128>}]} {
    %c0 = arith.constant 0 : index
    %c0_0 = arith.constant 0 : index
    %c0_1 = arith.constant 0 : index
    %c0_2 = arith.constant 0 : index
    %0 = vector.load %arg2[%c0, %c0_0, %c0_1, %c0_2] : memref<1x10x10x128xbf16, #tpu.memory_space<vmem>>, vector<1x10x10x128xbf16>
    %1 = vector.shape_cast %0 : vector<1x10x10x128xbf16> to vector<10x10x128xbf16>
    %2 = arith.extf %1 : vector<10x10x128xbf16> to vector<10x10x128xf32>
    %c0_3 = arith.constant 0 : index
    %c0_4 = arith.constant 0 : index
    %3 = vector.load %arg3[%c0_3, %c0_4] : memref<9x128xf32, #tpu.memory_space<vmem>>, vector<9x128xf32>
    %4 = vector.extract_strided_slice %2 {offsets = [0, 0, 0], sizes = [10, 8, 128], strides = [1, 1, 1]} : vector<10x10x128xf32> to vector<10x8x128xf32>
    %5 = vector.extract_strided_slice %4 {offsets = [0, 0, 0], sizes = [8, 8, 128], strides = [1, 1, 1]} : vector<10x8x128xf32> to vector<8x8x128xf32>
    %6 = vector.extract_strided_slice %3 {offsets = [0, 0], sizes = [1, 128], strides = [1, 1]} : vector<9x128xf32> to vector<1x128xf32>
    %7 = vector.shape_cast %6 : vector<1x128xf32> to vector<128xf32>
    %8 = vector.shape_cast %7 : vector<128xf32> to vector<1x1x128xf32>
    %9 = vector.broadcast %8 : vector<1x1x128xf32> to vector<8x8x128xf32>
    %10 = arith.mulf %5, %9 : vector<8x8x128xf32>
    %11 = vector.extract_strided_slice %4 {offsets = [1, 0, 0], sizes = [8, 8, 128], strides = [1, 1, 1]} : vector<10x8x128xf32> to vector<8x8x128xf32>
    %12 = vector.extract_strided_slice %3 {offsets = [3, 0], sizes = [1, 128], strides = [1, 1]} : vector<9x128xf32> to vector<1x128xf32>
    %13 = vector.shape_cast %12 : vector<1x128xf32> to vector<128xf32>
    %14 = vector.shape_cast %13 : vector<128xf32> to vector<1x1x128xf32>
    %15 = vector.broadcast %14 : vector<1x1x128xf32> to vector<8x8x128xf32>
    %16 = arith.mulf %11, %15 : vector<8x8x128xf32>
    %17 = arith.addf %10, %16 : vector<8x8x128xf32>
    %18 = vector.extract_strided_slice %4 {offsets = [2, 0, 0], sizes = [8, 8, 128], strides = [1, 1, 1]} : vector<10x8x128xf32> to vector<8x8x128xf32>
    %19 = vector.extract_strided_slice %3 {offsets = [6, 0], sizes = [1, 128], strides = [1, 1]} : vector<9x128xf32> to vector<1x128xf32>
    %20 = vector.shape_cast %19 : vector<1x128xf32> to vector<128xf32>
    %21 = vector.shape_cast %20 : vector<128xf32> to vector<1x1x128xf32>
    %22 = vector.broadcast %21 : vector<1x1x128xf32> to vector<8x8x128xf32>
    %23 = arith.mulf %18, %22 : vector<8x8x128xf32>
    %24 = arith.addf %17, %23 : vector<8x8x128xf32>
    %25 = vector.extract_strided_slice %2 {offsets = [0, 1, 0], sizes = [10, 8, 128], strides = [1, 1, 1]} : vector<10x10x128xf32> to vector<10x8x128xf32>
    %26 = vector.extract_strided_slice %25 {offsets = [0, 0, 0], sizes = [8, 8, 128], strides = [1, 1, 1]} : vector<10x8x128xf32> to vector<8x8x128xf32>
    %27 = vector.extract_strided_slice %3 {offsets = [1, 0], sizes = [1, 128], strides = [1, 1]} : vector<9x128xf32> to vector<1x128xf32>
    %28 = vector.shape_cast %27 : vector<1x128xf32> to vector<128xf32>
    %29 = vector.shape_cast %28 : vector<128xf32> to vector<1x1x128xf32>
    %30 = vector.broadcast %29 : vector<1x1x128xf32> to vector<8x8x128xf32>
    %31 = arith.mulf %26, %30 : vector<8x8x128xf32>
    %32 = arith.addf %24, %31 : vector<8x8x128xf32>
    %33 = vector.extract_strided_slice %25 {offsets = [1, 0, 0], sizes = [8, 8, 128], strides = [1, 1, 1]} : vector<10x8x128xf32> to vector<8x8x128xf32>
    %34 = vector.extract_strided_slice %3 {offsets = [4, 0], sizes = [1, 128], strides = [1, 1]} : vector<9x128xf32> to vector<1x128xf32>
    %35 = vector.shape_cast %34 : vector<1x128xf32> to vector<128xf32>
    %36 = vector.shape_cast %35 : vector<128xf32> to vector<1x1x128xf32>
    %37 = vector.broadcast %36 : vector<1x1x128xf32> to vector<8x8x128xf32>
    %38 = arith.mulf %33, %37 : vector<8x8x128xf32>
    %39 = arith.addf %32, %38 : vector<8x8x128xf32>
    %40 = vector.extract_strided_slice %25 {offsets = [2, 0, 0], sizes = [8, 8, 128], strides = [1, 1, 1]} : vector<10x8x128xf32> to vector<8x8x128xf32>
    %41 = vector.extract_strided_slice %3 {offsets = [7, 0], sizes = [1, 128], strides = [1, 1]} : vector<9x128xf32> to vector<1x128xf32>
    %42 = vector.shape_cast %41 : vector<1x128xf32> to vector<128xf32>
    %43 = vector.shape_cast %42 : vector<128xf32> to vector<1x1x128xf32>
    %44 = vector.broadcast %43 : vector<1x1x128xf32> to vector<8x8x128xf32>
    %45 = arith.mulf %40, %44 : vector<8x8x128xf32>
    %46 = arith.addf %39, %45 : vector<8x8x128xf32>
    %47 = vector.extract_strided_slice %2 {offsets = [0, 2, 0], sizes = [10, 8, 128], strides = [1, 1, 1]} : vector<10x10x128xf32> to vector<10x8x128xf32>
    %48 = vector.extract_strided_slice %47 {offsets = [0, 0, 0], sizes = [8, 8, 128], strides = [1, 1, 1]} : vector<10x8x128xf32> to vector<8x8x128xf32>
    %49 = vector.extract_strided_slice %3 {offsets = [2, 0], sizes = [1, 128], strides = [1, 1]} : vector<9x128xf32> to vector<1x128xf32>
    %50 = vector.shape_cast %49 : vector<1x128xf32> to vector<128xf32>
    %51 = vector.shape_cast %50 : vector<128xf32> to vector<1x1x128xf32>
    %52 = vector.broadcast %51 : vector<1x1x128xf32> to vector<8x8x128xf32>
    %53 = arith.mulf %48, %52 : vector<8x8x128xf32>
    %54 = arith.addf %46, %53 : vector<8x8x128xf32>
    %55 = vector.extract_strided_slice %47 {offsets = [1, 0, 0], sizes = [8, 8, 128], strides = [1, 1, 1]} : vector<10x8x128xf32> to vector<8x8x128xf32>
    %56 = vector.extract_strided_slice %3 {offsets = [5, 0], sizes = [1, 128], strides = [1, 1]} : vector<9x128xf32> to vector<1x128xf32>
    %57 = vector.shape_cast %56 : vector<1x128xf32> to vector<128xf32>
    %58 = vector.shape_cast %57 : vector<128xf32> to vector<1x1x128xf32>
    %59 = vector.broadcast %58 : vector<1x1x128xf32> to vector<8x8x128xf32>
    %60 = arith.mulf %55, %59 : vector<8x8x128xf32>
    %61 = arith.addf %54, %60 : vector<8x8x128xf32>
    %62 = vector.extract_strided_slice %47 {offsets = [2, 0, 0], sizes = [8, 8, 128], strides = [1, 1, 1]} : vector<10x8x128xf32> to vector<8x8x128xf32>
    %63 = vector.extract_strided_slice %3 {offsets = [8, 0], sizes = [1, 128], strides = [1, 1]} : vector<9x128xf32> to vector<1x128xf32>
    %64 = vector.shape_cast %63 : vector<1x128xf32> to vector<128xf32>
    %65 = vector.shape_cast %64 : vector<128xf32> to vector<1x1x128xf32>
    %66 = vector.broadcast %65 : vector<1x1x128xf32> to vector<8x8x128xf32>
    %67 = arith.mulf %62, %66 : vector<8x8x128xf32>
    %68 = arith.addf %61, %67 : vector<8x8x128xf32>
    %c0_5 = arith.constant 0 : index
    %c0_6 = arith.constant 0 : index
    %69 = vector.load %arg4[%c0_5, %c0_6] : memref<1x128xf32, #tpu.memory_space<vmem>>, vector<1x128xf32>
    %70 = vector.shape_cast %69 : vector<1x128xf32> to vector<128xf32>
    %71 = vector.shape_cast %70 : vector<128xf32> to vector<1x1x128xf32>
    %72 = vector.broadcast %71 : vector<1x1x128xf32> to vector<8x8x128xf32>
    %73 = arith.addf %68, %72 : vector<8x8x128xf32>
    %74 = arith.negf %73 : vector<8x8x128xf32>
    %75 = math.exp %74 : vector<8x8x128xf32>
    %cst = arith.constant 1.000000e+00 : f32
    %76 = vector.broadcast %cst : f32 to vector<8x8x128xf32>
    %77 = arith.addf %76, %75 : vector<8x8x128xf32>
    %78 = arith.divf %76, %77 : vector<8x8x128xf32>
    %79 = arith.mulf %73, %78 : vector<8x8x128xf32>
    %80 = arith.truncf %79 : vector<8x8x128xf32> to vector<8x8x128xbf16>
    %c0_7 = arith.constant 0 : index
    %c0_8 = arith.constant 0 : index
    %c0_9 = arith.constant 0 : index
    %c0_10 = arith.constant 0 : index
    %81 = vector.load %arg5[%c0_7, %c0_8, %c0_9, %c0_10] : memref<1x8x8x128xbf16, #tpu.memory_space<vmem>>, vector<1x8x8x128xbf16>
    %82 = vector.shape_cast %81 : vector<1x8x8x128xbf16> to vector<8x8x128xbf16>
    %83 = vector.shape_cast %80 : vector<8x8x128xbf16> to vector<1x8x8x128xbf16>
    tpu.vector_store %arg5[%c0_7, %c0_8, %c0_9, %c0_10], %83 {strides = array<i32>} : memref<1x8x8x128xbf16, #tpu.memory_space<vmem>>, vector<1x8x8x128xbf16>,
    %c0_i32 = arith.constant 0 : i32
    %84 = arith.cmpi eq, %arg1, %c0_i32 : i32
    %85 = arith.extui %84 : i1 to i32
    %c0_i32_11 = arith.constant 0 : i32
    %86 = arith.cmpi ne, %85, %c0_i32_11 : i32
    scf.if %86 {
      %cst_19 = arith.constant 0.000000e+00 : f32
      %92 = vector.broadcast %cst_19 : f32 to vector<1x1x128xf32>
      %c0_20 = arith.constant 0 : index
      %c0_21 = arith.constant 0 : index
      %c0_22 = arith.constant 0 : index
      %93 = vector.load %arg6[%c0_20, %c0_21, %c0_22] : memref<1x1x128xf32, #tpu.memory_space<vmem>>, vector<1x1x128xf32>
      tpu.vector_store %arg6[%c0_20, %c0_21, %c0_22], %92 {strides = array<i32>} : memref<1x1x128xf32, #tpu.memory_space<vmem>>, vector<1x1x128xf32>,
    } else {
    }
    %c0_12 = arith.constant 0 : index
    %c0_13 = arith.constant 0 : index
    %c0_14 = arith.constant 0 : index
    %87 = vector.load %arg6[%c0_12, %c0_13, %c0_14] : memref<1x1x128xf32, #tpu.memory_space<vmem>>, vector<1x1x128xf32>
    %cst_15 = arith.constant dense<0.000000e+00> : vector<128xf32>
    %88 = vector.multi_reduction <add>, %79, %cst_15 [0, 1] : vector<8x8x128xf32> to vector<128xf32>
    %89 = vector.shape_cast %88 : vector<128xf32> to vector<1x1x128xf32>
    %90 = arith.addf %87, %89 : vector<1x1x128xf32>
    %c0_16 = arith.constant 0 : index
    %c0_17 = arith.constant 0 : index
    %c0_18 = arith.constant 0 : index
    %91 = vector.load %arg6[%c0_16, %c0_17, %c0_18] : memref<1x1x128xf32, #tpu.memory_space<vmem>>, vector<1x1x128xf32>
    tpu.vector_store %arg6[%c0_16, %c0_17, %c0_18], %90 {strides = array<i32>} : memref<1x1x128xf32, #tpu.memory_space<vmem>>, vector<1x1x128xf32>,
    return
  }
  func.func @transform_0(%arg0: i32, %arg1: i32) -> (i32, i32, i32, i32) {
    %c1_i32 = arith.constant 1 : i32
    %0 = arith.muli %arg0, %c1_i32 : i32
    %1 = arith.addi %0, %arg1 : i32
    %c0_i32 = arith.constant 0 : i32
    %c0_i32_0 = arith.constant 0 : i32
    %c0_i32_1 = arith.constant 0 : i32
    %c0_i32_2 = arith.constant 0 : i32
    return %1, %c0_i32, %c0_i32_0, %c0_i32_1 : i32, i32, i32, i32
  }
  func.func @transform_1(%arg0: i32, %arg1: i32) -> (i32, i32) {
    %c0_i32 = arith.constant 0 : i32
    %c0_i32_0 = arith.constant 0 : i32
    %c0_i32_1 = arith.constant 0 : i32
    return %c0_i32, %c0_i32_0 : i32, i32
  }
  func.func @transform_2(%arg0: i32, %arg1: i32) -> (i32, i32) {
    %c0_i32 = arith.constant 0 : i32
    %c0_i32_0 = arith.constant 0 : i32
    %c0_i32_1 = arith.constant 0 : i32
    return %c0_i32, %c0_i32_0 : i32, i32
  }
  func.func @transform_3(%arg0: i32, %arg1: i32) -> (i32, i32, i32, i32) {
    %c0_i32 = arith.constant 0 : i32
    %c0_i32_0 = arith.constant 0 : i32
    %c0_i32_1 = arith.constant 0 : i32
    return %arg0, %arg1, %c0_i32, %c0_i32_0 : i32, i32, i32, i32
  }
  func.func @transform_4(%arg0: i32, %arg1: i32) -> (i32, i32, i32) {
    %c0_i32 = arith.constant 0 : i32
    %c0_i32_0 = arith.constant 0 : i32
    %c0_i32_1 = arith.constant 0 : i32
    return %arg0, %c0_i32, %c0_i32_0 : i32, i32, i32
  }
}

module attributes {stable_mosaic.version = 11 : i64} {
  func.func @_se_gate_kernel(%arg0: memref<2x128xf32, #tpu.memory_space<vmem>>, %arg1: memref<128x8xbf16, #tpu.memory_space<vmem>>, %arg2: memref<1x8xf32, #tpu.memory_space<vmem>>, %arg3: memref<8x128xbf16, #tpu.memory_space<vmem>>, %arg4: memref<1x128xf32, #tpu.memory_space<vmem>>, %arg5: memref<2x128xf32, #tpu.memory_space<vmem>>) attributes {dimension_semantics = [], scalar_prefetch = 0 : i64, scratch_operands = 0 : i64, tpu.core_type = #tpu.core_type<tc>} {
    %c0 = arith.constant 0 : index
    %c0_0 = arith.constant 0 : index
    %0 = vector.load %arg0[%c0, %c0_0] : memref<2x128xf32, #tpu.memory_space<vmem>>, vector<2x128xf32>
    %1 = arith.truncf %0 : vector<2x128xf32> to vector<2x128xbf16>
    %c0_1 = arith.constant 0 : index
    %c0_2 = arith.constant 0 : index
    %2 = vector.load %arg1[%c0_1, %c0_2] : memref<128x8xbf16, #tpu.memory_space<vmem>>, vector<128x8xbf16>
    %cst = arith.constant dense<0.000000e+00> : vector<2x8xf32>
    %3 = tpu.matmul %1, %2, %cst {dimension_numbers = #tpu.dot_dimension_numbers<[1], [0], [0], [1], [0, 0, 1, 1], [], []>} : vector<2x128xbf16>, vector<128x8xbf16>, vector<2x8xf32> -> vector<2x8xf32>
    %c0_3 = arith.constant 0 : index
    %c0_4 = arith.constant 0 : index
    %4 = vector.load %arg2[%c0_3, %c0_4] : memref<1x8xf32, #tpu.memory_space<vmem>>, vector<1x8xf32>
    %5 = vector.broadcast %4 : vector<1x8xf32> to vector<2x8xf32>
    %6 = arith.addf %3, %5 : vector<2x8xf32>
    %7 = arith.negf %6 : vector<2x8xf32>
    %8 = math.exp %7 : vector<2x8xf32>
    %cst_5 = arith.constant 1.000000e+00 : f32
    %9 = vector.broadcast %cst_5 : f32 to vector<2x8xf32>
    %10 = arith.addf %9, %8 : vector<2x8xf32>
    %11 = arith.divf %9, %10 : vector<2x8xf32>
    %12 = arith.mulf %6, %11 : vector<2x8xf32>
    %13 = arith.truncf %12 : vector<2x8xf32> to vector<2x8xbf16>
    %c0_6 = arith.constant 0 : index
    %c0_7 = arith.constant 0 : index
    %14 = vector.load %arg3[%c0_6, %c0_7] : memref<8x128xbf16, #tpu.memory_space<vmem>>, vector<8x128xbf16>
    %cst_8 = arith.constant dense<0.000000e+00> : vector<2x128xf32>
    %15 = tpu.matmul %13, %14, %cst_8 {dimension_numbers = #tpu.dot_dimension_numbers<[1], [0], [0], [1], [0, 0, 1, 1], [], []>} : vector<2x8xbf16>, vector<8x128xbf16>, vector<2x128xf32> -> vector<2x128xf32>
    %c0_9 = arith.constant 0 : index
    %c0_10 = arith.constant 0 : index
    %16 = vector.load %arg4[%c0_9, %c0_10] : memref<1x128xf32, #tpu.memory_space<vmem>>, vector<1x128xf32>
    %17 = vector.broadcast %16 : vector<1x128xf32> to vector<2x128xf32>
    %18 = arith.addf %15, %17 : vector<2x128xf32>
    %19 = arith.negf %18 : vector<2x128xf32>
    %20 = math.exp %19 : vector<2x128xf32>
    %cst_11 = arith.constant 1.000000e+00 : f32
    %21 = vector.broadcast %cst_11 : f32 to vector<2x128xf32>
    %22 = arith.addf %21, %20 : vector<2x128xf32>
    %23 = arith.divf %21, %22 : vector<2x128xf32>
    %c0_12 = arith.constant 0 : index
    %c0_13 = arith.constant 0 : index
    %24 = vector.load %arg5[%c0_12, %c0_13] : memref<2x128xf32, #tpu.memory_space<vmem>>, vector<2x128xf32>
    tpu.vector_store %arg5[%c0_12, %c0_13], %23 {strides = array<i32>} : memref<2x128xf32, #tpu.memory_space<vmem>>, vector<2x128xf32>,
    return
  }
}

module attributes {stable_mosaic.version = 11 : i64} {
  func.func @_gate_head_kernel(%arg0: i32, %arg1: i32, %arg2: memref<1x64x128xbf16, #tpu.memory_space<vmem>>, %arg3: memref<1x1x128xf32, #tpu.memory_space<vmem>>, %arg4: memref<1x64x128xbf16, #tpu.memory_space<vmem>>, %arg5: memref<128x128xbf16, #tpu.memory_space<vmem>>, %arg6: memref<1x128xf32, #tpu.memory_space<vmem>>, %arg7: memref<1x64x128xf32, #tpu.memory_space<vmem>>) attributes {dimension_semantics = [#tpu.dimension_semantics<parallel>, #tpu.dimension_semantics<parallel>], iteration_bounds = array<i64: 2, 1>, scalar_prefetch = 0 : i64, scratch_operands = 0 : i64, tpu.core_type = #tpu.core_type<tc>, window_params = [{transform_indices = @transform_0, window_bounds = array<i64: 1, 64, 128>}, {transform_indices = @transform_1, window_bounds = array<i64: 1, 1, 128>}, {transform_indices = @transform_2, window_bounds = array<i64: 1, 64, 128>}, {pipeline_mode = #tpu.pipeline_mode<synchronous>, transform_indices = @transform_3, window_bounds = array<i64: 128, 128>}, {pipeline_mode = #tpu.pipeline_mode<synchronous>, transform_indices = @transform_4, window_bounds = array<i64: 1, 128>}, {transform_indices = @transform_5, window_bounds = array<i64: 1, 64, 128>}]} {
    %c0 = arith.constant 0 : index
    %c0_0 = arith.constant 0 : index
    %c0_1 = arith.constant 0 : index
    %0 = vector.load %arg2[%c0, %c0_0, %c0_1] : memref<1x64x128xbf16, #tpu.memory_space<vmem>>, vector<1x64x128xbf16>
    %1 = vector.shape_cast %0 : vector<1x64x128xbf16> to vector<64x128xbf16>
    %2 = arith.extf %1 : vector<64x128xbf16> to vector<64x128xf32>
    %c0_2 = arith.constant 0 : index
    %c0_3 = arith.constant 0 : index
    %c0_4 = arith.constant 0 : index
    %3 = vector.load %arg3[%c0_2, %c0_3, %c0_4] : memref<1x1x128xf32, #tpu.memory_space<vmem>>, vector<1x1x128xf32>
    %4 = vector.shape_cast %3 : vector<1x1x128xf32> to vector<1x128xf32>
    %5 = vector.broadcast %4 : vector<1x128xf32> to vector<64x128xf32>
    %6 = arith.mulf %2, %5 : vector<64x128xf32>
    %7 = arith.truncf %6 : vector<64x128xf32> to vector<64x128xbf16>
    %c0_5 = arith.constant 0 : index
    %c0_6 = arith.constant 0 : index
    %8 = vector.load %arg5[%c0_5, %c0_6] : memref<128x128xbf16, #tpu.memory_space<vmem>>, vector<128x128xbf16>
    %cst = arith.constant dense<0.000000e+00> : vector<64x128xf32>
    %9 = tpu.matmul %7, %8, %cst {dimension_numbers = #tpu.dot_dimension_numbers<[1], [0], [0], [1], [0, 0, 1, 1], [], []>} : vector<64x128xbf16>, vector<128x128xbf16>, vector<64x128xf32> -> vector<64x128xf32>
    %c0_7 = arith.constant 0 : index
    %c0_8 = arith.constant 0 : index
    %c0_9 = arith.constant 0 : index
    %10 = vector.load %arg4[%c0_7, %c0_8, %c0_9] : memref<1x64x128xbf16, #tpu.memory_space<vmem>>, vector<1x64x128xbf16>
    %11 = vector.shape_cast %10 : vector<1x64x128xbf16> to vector<64x128xbf16>
    %12 = arith.extf %11 : vector<64x128xbf16> to vector<64x128xf32>
    %13 = arith.addf %9, %12 : vector<64x128xf32>
    %c0_10 = arith.constant 0 : index
    %c0_11 = arith.constant 0 : index
    %14 = vector.load %arg6[%c0_10, %c0_11] : memref<1x128xf32, #tpu.memory_space<vmem>>, vector<1x128xf32>
    %15 = vector.broadcast %14 : vector<1x128xf32> to vector<64x128xf32>
    %16 = arith.addf %13, %15 : vector<64x128xf32>
    %17 = arith.negf %16 : vector<64x128xf32>
    %18 = math.exp %17 : vector<64x128xf32>
    %cst_12 = arith.constant 1.000000e+00 : f32
    %19 = vector.broadcast %cst_12 : f32 to vector<64x128xf32>
    %20 = arith.addf %19, %18 : vector<64x128xf32>
    %21 = arith.divf %19, %20 : vector<64x128xf32>
    %22 = arith.mulf %16, %21 : vector<64x128xf32>
    %c0_13 = arith.constant 0 : index
    %c0_14 = arith.constant 0 : index
    %c0_15 = arith.constant 0 : index
    %23 = vector.load %arg7[%c0_13, %c0_14, %c0_15] : memref<1x64x128xf32, #tpu.memory_space<vmem>>, vector<1x64x128xf32>
    %24 = vector.shape_cast %23 : vector<1x64x128xf32> to vector<64x128xf32>
    %25 = vector.shape_cast %22 : vector<64x128xf32> to vector<1x64x128xf32>
    tpu.vector_store %arg7[%c0_13, %c0_14, %c0_15], %25 {strides = array<i32>} : memref<1x64x128xf32, #tpu.memory_space<vmem>>, vector<1x64x128xf32>,
    return
  }
  func.func @transform_0(%arg0: i32, %arg1: i32) -> (i32, i32, i32) {
    %c0_i32 = arith.constant 0 : i32
    %c0_i32_0 = arith.constant 0 : i32
    return %arg0, %arg1, %c0_i32 : i32, i32, i32
  }
  func.func @transform_1(%arg0: i32, %arg1: i32) -> (i32, i32, i32) {
    %c0_i32 = arith.constant 0 : i32
    %c0_i32_0 = arith.constant 0 : i32
    %c0_i32_1 = arith.constant 0 : i32
    return %arg0, %c0_i32, %c0_i32_0 : i32, i32, i32
  }
  func.func @transform_2(%arg0: i32, %arg1: i32) -> (i32, i32, i32) {
    %c0_i32 = arith.constant 0 : i32
    %c0_i32_0 = arith.constant 0 : i32
    return %arg0, %arg1, %c0_i32 : i32, i32, i32
  }
  func.func @transform_3(%arg0: i32, %arg1: i32) -> (i32, i32) {
    %c0_i32 = arith.constant 0 : i32
    %c0_i32_0 = arith.constant 0 : i32
    %c0_i32_1 = arith.constant 0 : i32
    return %c0_i32, %c0_i32_0 : i32, i32
  }
  func.func @transform_4(%arg0: i32, %arg1: i32) -> (i32, i32) {
    %c0_i32 = arith.constant 0 : i32
    %c0_i32_0 = arith.constant 0 : i32
    %c0_i32_1 = arith.constant 0 : i32
    return %c0_i32, %c0_i32_0 : i32, i32
  }
  func.func @transform_5(%arg0: i32, %arg1: i32) -> (i32, i32, i32) {
    %c0_i32 = arith.constant 0 : i32
    %c0_i32_0 = arith.constant 0 : i32
    return %arg0, %arg1, %c0_i32 : i32, i32, i32
  }
}

</mosaic_0001>

<bundles_post_ra>
// kernel: efficientnet_features.6
= control target key start
LH: loop header
LB: loop body
LE: loop exit
PB: predicated region body
PF: predicated region fallthrough
CT: control target
= control target key end

     0   :  { %v277_v0 = vmov 0.0   ;;  %vm278_vm0 = vmmov 0   ;;  %vm154_vm1 = vcmask 1043456   ;;  %vm150_vm2 = vcmask 64512   ;;  %s348_s1 = inlined_call_operand.vmem [shape: bf16[128,8], index: 1, kind: input, shape index: {}]   ;;  %s349_s0 = inlined_call_operand.vmem [shape: f32[2,128], index: 0, kind: input, shape index: {}]   ;;  %s350_s3 = inlined_call_operand.vmem [shape: bf16[8,128], index: 3, kind: input, shape index: {}]   ;;  %s351_s2 = inlined_call_operand.vmem [shape: f32[1,8], index: 2, kind: input, shape index: {}]   ;;  %s352_s4 = inlined_call_operand.vmem [shape: f32[1,128], index: 4, kind: input, shape index: {}]   ;;  %s353_s5 = inlined_call_operand.vmem [shape: f32[2,128], index: 5, kind: output, shape index: {}]  }
   0x1   :  { %233 = vmatprep.subr.bf16.mxu0 %v277_v0  ;;  %v261_v1 = vld [vmem:[%s348_s1 + $0x38] sm:$0xff]   ;;  %249 = vmatprep.mubr.msk.bf16.mxu0 %vm278_vm0, %v277_v0  ;;  %v262_v2 = vld [vmem:[%s348_s1 + $0x30] sm:$0xff]   ;;  %v263_v3 = vld [vmem:[%s348_s1 + $0x28] sm:$0xff]  }
   0x2   :  { %253 = vmatprep.subr.bf16.mxu1 %v277_v0  ;;  %255 = vmatprep.mubr.msk.bf16.mxu1 %vm278_vm0, %v277_v0  ;;  %v264_v4 = vld [vmem:[%s348_s1 + $0x20] sm:$0xff]   ;;  %v265_v5 = vld [vmem:[%s348_s1 + $0x18] sm:$0xff]   ;;  %v266_v6 = vld [vmem:[%s348_s1 + $0x10] sm:$0xff]  }
   0x3   :  { %234 = vmatpush3.bf16.msra.mxu0 %v261_v1  ;;  %v267_v7 = vld [vmem:[%s348_s1 + $0x8] sm:$0xff]   ;;  %v268_v8 = vld [vmem:[%s348_s1] sm:$0xff]  }
   0x4   :  { %235 = vmatprep.subr.bf16.mxu0 %v277_v0  ;;  %v21_v9 = vld [vmem:[%s349_s0] sm:$0x3] }
   0x5   :  { %v22_v10 = vpack.c.bf16 %v21_v9, %v21_v9  ;;  %v142_v11 = vld [vmem:[%s350_s3] sm:$0xf] }
   0x6   :  { %v156_v12 = vsel %vm154_vm1, %v142_v11, 0  ;;  %v209_v13 = vld [vmem:[%s351_s2] ss:$0 sm:$0xff] }
   0x7   :  { %236 = vmatpush3.bf16.msra.mxu0 %v262_v2  ;;  %254 = vmatpush3.bf16.msra.mxu1 %v156_v12  ;;  %v219_v25 = vld [vmem:[%s352_s4] ss:$0 sm:$0xff] }
   0x8   :  { %237 = vmatprep.subr.bf16.mxu0 %v277_v0 }
   0xb   :  { %238 = vmatpush3.bf16.msra.mxu0 %v263_v3 }
   0xc   :  { %239 = vmatprep.subr.bf16.mxu0 %v277_v0 }
   0xf   :  { %240 = vmatpush3.bf16.msra.mxu0 %v264_v4 }
  0x10   :  { %241 = vmatprep.subr.bf16.mxu0 %v277_v0 }
  0x13   :  { %242 = vmatpush3.bf16.msra.mxu0 %v265_v5 }
  0x14   :  { %243 = vmatprep.subr.bf16.mxu0 %v277_v0 }
  0x17   :  { %244 = vmatpush3.bf16.msra.mxu0 %v266_v6 }
  0x18   :  { %245 = vmatprep.subr.bf16.mxu0 %v277_v0 }
  0x1b   :  { %246 = vmatpush3.bf16.msra.mxu0 %v267_v7 }
  0x1c   :  { %247 = vmatprep.subr.bf16.mxu0 %v277_v0 }
  0x1f   :  { %248 = vmatpush3.bf16.msra.mxu0 %v268_v8 }
  0x22   :  { %250 = vmatmul.mubr.bf16.vlgmr.msra.gmra.mxu0 %v22_v10 }
  0xe2   :  { %v128_v14 = vpop.f32.mrf.mxu0 }
  0xe3   :  { %v129_v15 = vadd.f32 %v209_v13, %v128_v14 }
  0xe4   :  { %v251_v16 = vpop.f32.mrf.mxu0 }
  0xe5   :  { %v218_v17 = vmul.f32 -1.442695, %v129_v15 }
  0xe6   :  { %v131_v18 = vpop.f32.mrf.mxu0 }
  0xe7   :  { %269 = vpow2.f32 %v218_v17 }
  0xe8   :  { %v252_v19 = vpop.f32.mrf.mxu0 }
  0xf4   :  { %v270_v20 = vpop.eup %269 }
  0xf5   :  { %v137_v21 = vadd.f32 1.0, %v270_v20 }
  0xf7   :  { %271 = vrcp.f32 %v137_v21 }
 0x104   :  { %v272_v22 = vpop.eup %271 }
 0x105   :  { %v140_v23 = vmul.f32 %v272_v22, %v129_v15 }
 0x107   :  { %v141_v24 = vpack.c.bf16 %v140_v23, %v140_v23 }
 0x109   :  { %256 = vmatmul.mubr.msk.bf16.vlgmr.msra.gmra.mxu1 %vm150_vm2, %v141_v24 }
 0x1c9   :  { %v192_v26 = vpop.f32.mrf.mxu1 }
 0x1ca   :  { %v193_v27 = vadd.f32 %v219_v25, %v192_v26 }
 0x1cb   :  { %v257_v28 = vpop.f32.mrf.mxu1 }
 0x1cc   :  { %v221_v29 = vmul.f32 -1.442695, %v193_v27 }
 0x1cd   :  { %v195_v30 = vpop.f32.mrf.mxu1 }
 0x1ce   :  { %273 = vpow2.f32 %v221_v29 }
 0x1cf   :  { %v258_v31 = vpop.f32.mrf.mxu1 }
 0x1db   :  { %v274_v32 = vpop.eup %273 }
 0x1dc   :  { %v201_v33 = vadd.f32 1.0, %v274_v32 }
 0x1de   :  { %275 = vrcp.f32 %v201_v33 }
 0x1eb   :  { %v276_v34 = vpop.eup %275 }
 0x1ec   :  { %204 = vst [vmem:[%s353_s5] sm:$0x3] %v276_v34 }

// kernel: efficientnet_features.5
= control target key start
LH: loop header
LB: loop body
LE: loop exit
PB: predicated region body
PF: predicated region fallthrough
CT: control target
= control target key end

     0   :  { %s1155_s15 = smov 0   ;;  %s1157_s16 = smov 0   ;;  %s1545_s0 = inlined_call_operand.vmem [shape: bf16[2,10,10,128], index: 0, kind: input, shape index: {}]   ;;  %s1546_s1 = inlined_call_operand.vmem [shape: f32[9,128], index: 1, kind: input, shape index: {}]   ;;  %s1547_s2 = inlined_call_operand.vmem [shape: f32[1,128], index: 2, kind: input, shape index: {}]   ;;  %s1548_s3 = inlined_call_operand.vmem [shape: bf16[2,8,8,128], index: 3, kind: output, shape index: {0}]   ;;  %s1549_s4 = inlined_call_operand.vmem [shape: f32[2,1,128], index: 4, kind: output, shape index: {1}]  }
   0x1   :  { %s1159_s17 = smov 0  }
   0x2 LB: > { %s27_s18 = sadd.s32 1, %s1123_s16  ;;  %p1007_p0 = scmp.ge.s32.totalorder %s1127_s17, 1  ;;  %s1127_s17 = sphi %s1159_s17, %s15_s17   ;;  %s1123_s16 = sphi %s1157_s16, %s1555_s16   ;;  %s1119_s15 = sphi %s1155_s15, %s1554_s15  }
   0x3   : > { %p29_p1 = scmp.ge.s32.totalorder %s27_s18, 2  ;;  %p183_p2 = scmp.lt.s32.totalorder %s1127_s17, 3 }
   0x5   : > { %s1557_s18 = smov (%p29_p1, %s27_s18), 0  ;;  %p184_p3 = pnand %p1007_p0, %p183_p2 }
   0x6   : > { %p218_p4 = scmp.lt.s32.totalorder (!%p184_p3), %s1119_s15, 1 }
   0x7   : > { %187 = sbr.rel (%p184_p3) target bundleno = 173 (0xad), region = 32 }
   0xc   : > { %v279_v0 = vlaneseq  ;;  %s1559_s15 = smov (!%p218_p4, %s1119_s15), 1  ;;  %v277_v2 = vld [vmem:[%s1546_s1] sm:$0xff]  ;;  %v1129_v7 = vmov 0.0   ;;  %vm367_vm0 = vcmask 1046528   ;;  %vm596_vm1 = vcmask 1045504  }
   0xd   : > { %s1182_s23 = scalar_lea.vmem %s1549_s4, %s1559_s15  ;;  %s1047_s24 = smul.u32 80, %s1559_s15 }
   0xe   : > { %v280_v1 = vshrl.u32 %v279_v0, 7  ;;  %880 = vst [vmem:[%s1182_s23] sm:$0x1] %v1129_v7  ;;  %s1023_s6 = sshll.u32 %s1559_s15, 5 }
   0xf   : > { %s1189_s27 = scalar_lea.vmem %s1545_s0, %s1047_s24  ;;  %s232_s9 = scalar_lea.vmem %s1548_s3, %s1023_s6 }
  0x10   : > { %v281_v3 = vsub.s32 0, %v280_v1  ;;  %v293_v4 = vsub.s32 3, %v280_v1  ;;  %v313_v5 = vsub.s32 6, %v280_v1  ;;  %v333_v6 = vsub.s32 1, %v280_v1  ;;  %v237_v16 = vld [vmem:[%s1189_s27] ss:$8 sps:$4 sm:$0xff]  }
  0x11   : > { %v410_v8 = vsub.s32 4, %v280_v1  ;;  %v486_v9 = vsub.s32 7, %v280_v1  ;;  %v562_v10 = vsub.s32 2, %v280_v1  ;;  %v639_v11 = vsub.s32 5, %v280_v1  ;;  %v1197_v17 = vld [vmem:[%s1189_s27 + $0x4] sm:$0x1] }
  0x12   : > { %v282_v12 = vrot.slane %v277_v2, %v281_v3  ;;  %v294_v13 = vrot.slane %v277_v2, %v293_v4  ;;  %v1191_v14 = vrot.slane %v277_v2, %v313_v5  ;;  %v1193_v15 = vrot.slane %v277_v2, %v333_v6  ;;  %v240_v18 = vld [vmem:[%s1189_s27 + $0xc] sm:$0x1]  ;;  %v241_v23 = vld [vmem:[%s1189_s27 + $0x10] ss:$8 sps:$4 sm:$0xff]   ;;  %v242_v24 = vld [vmem:[%s1189_s27 + $0x14] sm:$0x1] }
  0x13   : > { %v1200_v19 = vrot.slane %v277_v2, %v410_v8  ;;  %v1202_v20 = vrot.slane %v277_v2, %v486_v9  ;;  %v1204_v21 = vrot.slane %v277_v2, %v562_v10  ;;  %v1206_v22 = vrot.slane %v277_v2, %v639_v11  ;;  %v244_v25 = vld [vmem:[%s1189_s27 + $0x1c] sm:$0x1]  ;;  %v245_v30 = vld [vmem:[%s1189_s27 + $0x20] ss:$8 sps:$4 sm:$0xff]   ;;  %v246_v31 = vld [vmem:[%s1189_s27 + $0x24] sm:$0x1] }
  0x14   : > { %v1211_v26 = vunpack.c.l.bf16 %v237_v16  ;;  %v1550_v27 = vunpack.c.l.bf16 %v1197_v17  ;;  %v1214_v28 = vunpack.c.h.bf16 %v237_v16  ;;  %v1216_v29 = vunpack.c.l.bf16 %v240_v18  ;;  %v248_v32 = vld [vmem:[%s1189_s27 + $0x2c] sm:$0x1]  ;;  %v249_v37 = vld [vmem:[%s1189_s27 + $0x30] ss:$8 sps:$4 sm:$0xff]   ;;  %v250_v38 = vld [vmem:[%s1189_s27 + $0x34] sm:$0x1] }
  0x15   : > { %v1221_v33 = vunpack.c.l.bf16 %v241_v23  ;;  %v1223_v34 = vunpack.c.l.bf16 %v242_v24  ;;  %v1225_v35 = vunpack.c.h.bf16 %v241_v23  ;;  %v1227_v36 = vunpack.c.l.bf16 %v244_v25  ;;  %v252_v39 = vld [vmem:[%s1189_s27 + $0x3c] sm:$0x1]  ;;  %v253_v44 = vld [vmem:[%s1189_s27 + $0x40] ss:$8 sps:$4 sm:$0xff]   ;;  %v254_v45 = vld [vmem:[%s1189_s27 + $0x44] sm:$0x1] }
  0x16   : > { %v1232_v40 = vunpack.c.l.bf16 %v245_v30  ;;  %v1234_v41 = vunpack.c.l.bf16 %v246_v31  ;;  %v1236_v42 = vunpack.c.h.bf16 %v245_v30  ;;  %v1238_v43 = vunpack.c.l.bf16 %v248_v32  ;;  %v1243_v46 = vld [vmem:[%s1189_s27 + $0x4c] sm:$0x1] }
  0x17   : > { %v1245_v47 = vunpack.c.l.bf16 %v249_v37  ;;  %v1247_v48 = vunpack.c.l.bf16 %v250_v38  ;;  %v1249_v49 = vunpack.c.h.bf16 %v249_v37  ;;  %v1251_v50 = vunpack.c.l.bf16 %v252_v39 }
  0x18   : > { %v1253_v51 = vunpack.c.l.bf16 %v253_v44  ;;  %v1255_v52 = vunpack.c.l.bf16 %v254_v45  ;;  %v1257_v53 = vunpack.c.h.bf16 %v253_v44  ;;  %v283_v55 = vmul.f32 %v282_v12, %v1211_v26 }
  0x19   : > { %v284_v56 = vmul.f32 %v282_v12, %v1214_v28  ;;  %v285_v57 = vmul.f32 %v282_v12, %v1221_v33  ;;  %v286_v58 = vmul.f32 %v282_v12, %v1225_v35  ;;  %v287_v59 = vmul.f32 %v282_v12, %v1232_v40 }
  0x1a   : > { %v288_v60 = vmul.f32 %v282_v12, %v1236_v42  ;;  %v289_v61 = vmul.f32 %v282_v12, %v1245_v47  ;;  %v290_v62 = vmul.f32 %v282_v12, %v1249_v49  ;;  %v295_v63 = vmul.f32 %v294_v13, %v1214_v28 }
  0x1b   : > { %v296_v0 = vmul.f32 %v294_v13, %v1221_v33  ;;  %v297_v1 = vmul.f32 %v294_v13, %v1225_v35  ;;  %v298_v2 = vmul.f32 %v294_v13, %v1232_v40  ;;  %v299_v3 = vmul.f32 %v294_v13, %v1236_v42 }
  0x1c   : > { %v300_v4 = vmul.f32 %v294_v13, %v1245_v47  ;;  %v301_v5 = vmul.f32 %v294_v13, %v1249_v49  ;;  %v302_v6 = vmul.f32 %v294_v13, %v1253_v51  ;;  %v303_v7 = vadd.f32 %v295_v63, %v283_v55 }
  0x1d   : > { %v304_v8 = vadd.f32 %v296_v0, %v284_v56  ;;  %v305_v9 = vadd.f32 %v297_v1, %v285_v57  ;;  %v306_v10 = vadd.f32 %v298_v2, %v286_v58  ;;  %v307_v11 = vadd.f32 %v299_v3, %v287_v59 }
  0x1e   : > { %v308_v12 = vadd.f32 %v300_v4, %v288_v60  ;;  %v309_v16 = vadd.f32 %v301_v5, %v289_v61  ;;  %v310_v18 = vadd.f32 %v302_v6, %v290_v62  ;;  %v315_v23 = vmul.f32 %v1191_v14, %v1221_v33 }
  0x1f   : > { %v316_v24 = vmul.f32 %v1191_v14, %v1225_v35  ;;  %v317_v25 = vmul.f32 %v1191_v14, %v1232_v40  ;;  %v318_v13 = vmul.f32 %v1191_v14, %v1236_v42  ;;  %v319_v30 = vmul.f32 %v1191_v14, %v1245_v47 }
  0x20   : > { %v320_v31 = vmul.f32 %v1191_v14, %v1249_v49  ;;  %v321_v32 = vmul.f32 %v1191_v14, %v1253_v51  ;;  %v322_v37 = vmul.f32 %v1191_v14, %v1257_v53  ;;  %v323_v38 = vadd.f32 %v315_v23, %v303_v7 }
  0x21   : > { %v324_v39 = vadd.f32 %v316_v24, %v304_v8  ;;  %v325_v44 = vadd.f32 %v317_v25, %v305_v9  ;;  %v326_v45 = vadd.f32 %v318_v13, %v306_v10  ;;  %v327_v55 = vadd.f32 %v319_v30, %v307_v11 }
  0x22   : > { %v328_v56 = vadd.f32 %v320_v31, %v308_v12  ;;  %v329_v57 = vadd.f32 %v321_v32, %v309_v16  ;;  %v330_v58 = vadd.f32 %v322_v37, %v310_v18  ;;  %v335_v59 = vmul.f32 %v1193_v15, %v1211_v26 }
  0x23   : > { %v336_v60 = vmul.f32 %v1193_v15, %v1550_v27  ;;  %v337_v61 = vmul.f32 %v1193_v15, %v1214_v28  ;;  %v338_v14 = vmul.f32 %v1193_v15, %v1216_v29  ;;  %v339_v62 = vmul.f32 %v1193_v15, %v1221_v33 }
  0x24   : > { %v340_v63 = vmul.f32 %v1193_v15, %v1223_v34  ;;  %v341_v0 = vmul.f32 %v1193_v15, %v1225_v35  ;;  %v342_v1 = vmul.f32 %v1193_v15, %v1227_v36  ;;  %v343_v2 = vmul.f32 %v1193_v15, %v1232_v40 }
  0x25   : > { %v344_v3 = vmul.f32 %v1193_v15, %v1234_v41  ;;  %v345_v4 = vmul.f32 %v1193_v15, %v1236_v42  ;;  %v346_v5 = vmul.f32 %v1193_v15, %v1238_v43  ;;  %v347_v6 = vmul.f32 %v1193_v15, %v1245_v47 }
  0x26   : > { %v348_v7 = vmul.f32 %v1193_v15, %v1247_v48  ;;  %v349_v8 = vmul.f32 %v1193_v15, %v1249_v49  ;;  %v350_v9 = vmul.f32 %v1193_v15, %v1251_v50  ;;  %v368_v10 = vrot.slane %v335_v59, 1 }
  0x27   : > { %v369_v11 = vrot.slane %v336_v60, 1  ;;  %v371_v12 = vrot.slane %v337_v61, 1  ;;  %v372_v16 = vrot.slane %v338_v14, 1  ;;  %v374_v18 = vrot.slane %v339_v62, 1 }
  0x28   : > { %v375_v23 = vrot.slane %v340_v63, 1  ;;  %v377_v24 = vrot.slane %v341_v0, 1  ;;  %v378_v25 = vrot.slane %v342_v1, 1  ;;  %v380_v31 = vrot.slane %v343_v2, 1 }
  0x29   : > { %v370_v13 = vsel %vm367_vm0, %v368_v10, %v369_v11  ;;  %v373_v30 = vsel %vm367_vm0, %v371_v12, %v372_v16  ;;  %v381_v32 = vrot.slane %v344_v3, 1  ;;  %v383_v54 = vrot.slane %v345_v4, 1 }
  0x2a   : > { %v376_v37 = vsel %vm367_vm0, %v374_v18, %v375_v23  ;;  %v379_v27 = vsel %vm367_vm0, %v377_v24, %v378_v25  ;;  %v384_v15 = vrot.slane %v346_v5, 1  ;;  %v386_v60 = vrot.slane %v347_v6, 1 }
  0x2b   : > { %v382_v59 = vsel %vm367_vm0, %v380_v31, %v381_v32  ;;  %v387_v61 = vrot.slane %v348_v7, 1  ;;  %v389_v14 = vrot.slane %v349_v8, 1  ;;  %v390_v63 = vrot.slane %v350_v9, 1 }
  0x2c   : > { %v385_v62 = vsel %vm367_vm0, %v383_v54, %v384_v15  ;;  %v400_v0 = vadd.f32 %v370_v13, %v323_v38  ;;  %v401_v1 = vadd.f32 %v373_v30, %v324_v39  ;;  %v402_v2 = vadd.f32 %v376_v37, %v325_v44 }
  0x2d   : > { %v388_v10 = vsel %vm367_vm0, %v386_v60, %v387_v61  ;;  %v403_v3 = vadd.f32 %v379_v27, %v326_v45  ;;  %v404_v11 = vadd.f32 %v382_v59, %v327_v55  ;;  %v391_v12 = vsel %vm367_vm0, %v389_v14, %v390_v63 }
  0x2e   : > { %v405_v16 = vadd.f32 %v385_v62, %v328_v56  ;;  %v406_v4 = vadd.f32 %v388_v10, %v329_v57  ;;  %v412_v5 = vmul.f32 %v1200_v19, %v1214_v28  ;;  %v407_v6 = vadd.f32 %v391_v12, %v330_v58 }
  0x2f   : > { %v413_v7 = vmul.f32 %v1200_v19, %v1216_v29  ;;  %v414_v54 = vmul.f32 %v1200_v19, %v1221_v33  ;;  %v415_v38 = vmul.f32 %v1200_v19, %v1223_v34  ;;  %v416_v27 = vmul.f32 %v1200_v19, %v1225_v35 }
  0x30   : > { %v417_v39 = vmul.f32 %v1200_v19, %v1227_v36  ;;  %v418_v44 = vmul.f32 %v1200_v19, %v1232_v40  ;;  %v419_v45 = vmul.f32 %v1200_v19, %v1234_v41  ;;  %v420_v55 = vmul.f32 %v1200_v19, %v1236_v42 }
  0x31   : > { %v421_v56 = vmul.f32 %v1200_v19, %v1238_v43  ;;  %v422_v57 = vmul.f32 %v1200_v19, %v1245_v47  ;;  %v423_v58 = vmul.f32 %v1200_v19, %v1247_v48  ;;  %v424_v8 = vmul.f32 %v1200_v19, %v1249_v49 }
  0x32   : > { %v425_v9 = vmul.f32 %v1200_v19, %v1251_v50  ;;  %v426_v18 = vmul.f32 %v1200_v19, %v1253_v51  ;;  %v427_v23 = vmul.f32 %v1200_v19, %v1255_v52  ;;  %v444_v24 = vrot.slane %v412_v5, 1 }
  0x33   : > { %v445_v25 = vrot.slane %v413_v7, 1  ;;  %v447_v13 = vrot.slane %v414_v54, 1  ;;  %v448_v30 = vrot.slane %v415_v38, 1  ;;  %v450_v31 = vrot.slane %v416_v27, 1 }
  0x34   : > { %v451_v32 = vrot.slane %v417_v39, 1  ;;  %v453_v37 = vrot.slane %v418_v44, 1  ;;  %v454_v15 = vrot.slane %v419_v45, 1  ;;  %v456_v61 = vrot.slane %v420_v55, 1 }
  0x35   : > { %v446_v59 = vsel %vm367_vm0, %v444_v24, %v445_v25  ;;  %v449_v60 = vsel %vm367_vm0, %v447_v13, %v448_v30  ;;  %v457_v14 = vrot.slane %v421_v56, 1  ;;  %v459_v10 = vrot.slane %v422_v57, 1 }
  0x36   : > { %v452_v62 = vsel %vm367_vm0, %v450_v31, %v451_v32  ;;  %v455_v63 = vsel %vm367_vm0, %v453_v37, %v454_v15  ;;  %v460_v19 = vrot.slane %v423_v58, 1  ;;  %v462_v5 = vrot.slane %v424_v8, 1 }
  0x37   : > { %v458_v12 = vsel %vm367_vm0, %v456_v61, %v457_v14  ;;  %v463_v7 = vrot.slane %v425_v9, 1  ;;  %v465_v54 = vrot.slane %v426_v18, 1  ;;  %v466_v27 = vrot.slane %v427_v23, 1 }
  0x38   : > { %v461_v38 = vsel %vm367_vm0, %v459_v10, %v460_v19  ;;  %v476_v39 = vadd.f32 %v446_v59, %v400_v0  ;;  %v477_v44 = vadd.f32 %v449_v60, %v401_v1  ;;  %v478_v55 = vadd.f32 %v452_v62, %v402_v2 }
  0x39   : > { %v464_v45 = vsel %vm367_vm0, %v462_v5, %v463_v7  ;;  %v479_v56 = vadd.f32 %v455_v63, %v403_v3  ;;  %v480_v24 = vadd.f32 %v458_v12, %v404_v11  ;;  %v467_v25 = vsel %vm367_vm0, %v465_v54, %v466_v27 }
  0x3a   : > { %v481_v13 = vadd.f32 %v461_v38, %v405_v16  ;;  %v482_v57 = vadd.f32 %v464_v45, %v406_v4  ;;  %v488_v58 = vmul.f32 %v1202_v20, %v1221_v33  ;;  %v483_v8 = vadd.f32 %v467_v25, %v407_v6 }
  0x3b   : > { %v489_v9 = vmul.f32 %v1202_v20, %v1223_v34  ;;  %v490_v0 = vmul.f32 %v1202_v20, %v1225_v35  ;;  %v491_v1 = vmul.f32 %v1202_v20, %v1227_v36  ;;  %v492_v2 = vmul.f32 %v1202_v20, %v1232_v40 }
  0x3c   : > { %v493_v3 = vmul.f32 %v1202_v20, %v1234_v41  ;;  %v494_v11 = vmul.f32 %v1202_v20, %v1236_v42  ;;  %v495_v16 = vmul.f32 %v1202_v20, %v1238_v43  ;;  %v496_v4 = vmul.f32 %v1202_v20, %v1245_v47 }
  0x3d   : > { %v497_v6 = vmul.f32 %v1202_v20, %v1247_v48  ;;  %v498_v18 = vmul.f32 %v1202_v20, %v1249_v49  ;;  %v499_v23 = vmul.f32 %v1202_v20, %v1251_v50  ;;  %v500_v30 = vmul.f32 %v1202_v20, %v1253_v51 }
  0x3e   : > { %v501_v31 = vmul.f32 %v1202_v20, %v1255_v52  ;;  %v502_v32 = vmul.f32 %v1202_v20, %v1257_v53  ;;  %v1551_v37 = vunpack.c.l.bf16 %v1243_v46  ;;  %v520_v59 = vrot.slane %v488_v58, 1 }
  0x3f   : > { %v521_v60 = vrot.slane %v489_v9, 1  ;;  %v523_v61 = vrot.slane %v490_v0, 1  ;;  %v524_v14 = vrot.slane %v491_v1, 1  ;;  %v526_v62 = vrot.slane %v492_v2, 1 }
  0x40   : > { %v503_v15 = vmul.f32 %v1202_v20, %v1551_v37  ;;  %v527_v63 = vrot.slane %v493_v3, 1  ;;  %v529_v10 = vrot.slane %v494_v11, 1  ;;  %v530_v19 = vrot.slane %v495_v16, 1 }
  0x41   : > { %v522_v12 = vsel %vm367_vm0, %v520_v59, %v521_v60  ;;  %v525_v5 = vsel %vm367_vm0, %v523_v61, %v524_v14  ;;  %v532_v7 = vrot.slane %v496_v4, 1  ;;  %v533_v54 = vrot.slane %v497_v6, 1 }
  0x42   : > { %v528_v38 = vsel %vm367_vm0, %v526_v62, %v527_v63  ;;  %v531_v27 = vsel %vm367_vm0, %v529_v10, %v530_v19  ;;  %v535_v45 = vrot.slane %v498_v18, 1  ;;  %v536_v20 = vrot.slane %v499_v23, 1 }
  0x43   : > { %v534_v25 = vsel %vm367_vm0, %v532_v7, %v533_v54  ;;  %v538_v58 = vrot.slane %v500_v30, 1  ;;  %v539_v9 = vrot.slane %v501_v31, 1  ;;  %v541_v0 = vrot.slane %v502_v32, 1 }
  0x44   : > { %v537_v1 = vsel %vm367_vm0, %v535_v45, %v536_v20  ;;  %v542_v2 = vrot.slane %v503_v15, 1  ;;  %v552_v3 = vadd.f32 %v522_v12, %v476_v39  ;;  %v553_v11 = vadd.f32 %v525_v5, %v477_v44 }
  0x45   : > { %v540_v16 = vsel %vm367_vm0, %v538_v58, %v539_v9  ;;  %v554_v4 = vadd.f32 %v528_v38, %v478_v55  ;;  %v555_v6 = vadd.f32 %v531_v27, %v479_v56  ;;  %v556_v37 = vadd.f32 %v534_v25, %v480_v24 }
  0x46   : > { %v543_v59 = vsel %vm367_vm0, %v541_v0, %v542_v2  ;;  %v557_v18 = vadd.f32 %v537_v1, %v481_v13  ;;  %v558_v23 = vadd.f32 %v540_v16, %v482_v57  ;;  %v564_v60 = vmul.f32 %v1204_v21, %v1211_v26 }
  0x47   : > { %v559_v30 = vadd.f32 %v543_v59, %v483_v8  ;;  %v1552_v31 = vunpack.c.l.bf16 %v1197_v17  ;;  %v566_v39 = vmul.f32 %v1204_v21, %v1214_v28  ;;  %v567_v44 = vmul.f32 %v1204_v21, %v1216_v29 }
  0x48   : > { %v568_v55 = vmul.f32 %v1204_v21, %v1221_v33  ;;  %v569_v56 = vmul.f32 %v1204_v21, %v1223_v34  ;;  %v570_v26 = vmul.f32 %v1204_v21, %v1225_v35  ;;  %v571_v17 = vmul.f32 %v1204_v21, %v1227_v36 }
  0x49   : > { %v565_v32 = vmul.f32 %v1204_v21, %v1552_v31  ;;  %v572_v24 = vmul.f32 %v1204_v21, %v1232_v40  ;;  %v573_v13 = vmul.f32 %v1204_v21, %v1234_v41  ;;  %v574_v57 = vmul.f32 %v1204_v21, %v1236_v42 }
  0x4a   : > { %v575_v8 = vmul.f32 %v1204_v21, %v1238_v43  ;;  %v576_v15 = vmul.f32 %v1204_v21, %v1245_v47  ;;  %v577_v61 = vmul.f32 %v1204_v21, %v1247_v48  ;;  %v578_v14 = vmul.f32 %v1204_v21, %v1249_v49 }
  0x4b   : > { %v579_v62 = vmul.f32 %v1204_v21, %v1251_v50  ;;  %v597_v63 = vrot.slane %v564_v60, 2  ;;  %v598_v10 = vrot.slane %v565_v32, 2  ;;  %v600_v19 = vrot.slane %v566_v39, 2 }
  0x4c   : > { %v601_v12 = vrot.slane %v567_v44, 2  ;;  %v603_v5 = vrot.slane %v568_v55, 2  ;;  %v604_v7 = vrot.slane %v569_v56, 2  ;;  %v606_v54 = vrot.slane %v570_v26, 2 }
  0x4d   : > { %v607_v38 = vrot.slane %v571_v17, 2  ;;  %v599_v27 = vsel %vm596_vm1, %v597_v63, %v598_v10  ;;  %v609_v20 = vrot.slane %v572_v24, 2  ;;  %v610_v25 = vrot.slane %v573_v13, 2 }
  0x4e   : > { %v602_v45 = vsel %vm596_vm1, %v600_v19, %v601_v12  ;;  %v605_v58 = vsel %vm596_vm1, %v603_v5, %v604_v7  ;;  %v612_v0 = vrot.slane %v574_v57, 2  ;;  %v613_v21 = vrot.slane %v575_v8, 2 }
  0x4f   : > { %v608_v9 = vsel %vm596_vm1, %v606_v54, %v607_v38  ;;  %v611_v1 = vsel %vm596_vm1, %v609_v20, %v610_v25  ;;  %v615_v2 = vrot.slane %v576_v15, 2  ;;  %v616_v16 = vrot.slane %v577_v61, 2 }
  0x50   : > { %v618_v59 = vrot.slane %v578_v14, 2  ;;  %v614_v60 = vsel %vm596_vm1, %v612_v0, %v613_v21  ;;  %v619_v31 = vrot.slane %v579_v62, 2  ;;  %v629_v32 = vadd.f32 %v599_v27, %v552_v3 }
  0x51   : > { %v630_v39 = vadd.f32 %v602_v45, %v553_v11  ;;  %v617_v44 = vsel %vm596_vm1, %v615_v2, %v616_v16  ;;  %v631_v55 = vadd.f32 %v605_v58, %v554_v4  ;;  %v632_v56 = vadd.f32 %v608_v9, %v555_v6 }
  0x52   : > { %v633_v26 = vadd.f32 %v611_v1, %v556_v37  ;;  %v620_v17 = vsel %vm596_vm1, %v618_v59, %v619_v31  ;;  %v634_v24 = vadd.f32 %v614_v60, %v557_v18  ;;  %v635_v13 = vadd.f32 %v617_v44, %v558_v23  ;;  %v1011_v1 = vld [vmem:[%s1546_s1 + $0x8] ss:$0 sm:$0xff] }
  0x53   : > { %v641_v57 = vmul.f32 %v1206_v22, %v1214_v28  ;;  %v636_v8 = vadd.f32 %v620_v17, %v559_v30  ;;  %v642_v15 = vmul.f32 %v1206_v22, %v1216_v29  ;;  %v643_v3 = vmul.f32 %v1206_v22, %v1221_v33 }
  0x54   : > { %v644_v11 = vmul.f32 %v1206_v22, %v1223_v34  ;;  %v645_v4 = vmul.f32 %v1206_v22, %v1225_v35  ;;  %v646_v6 = vmul.f32 %v1206_v22, %v1227_v36  ;;  %v647_v37 = vmul.f32 %v1206_v22, %v1232_v40 }
  0x55   : > { %v648_v28 = vmul.f32 %v1206_v22, %v1234_v41  ;;  %v649_v29 = vmul.f32 %v1206_v22, %v1236_v42  ;;  %v650_v18 = vmul.f32 %v1206_v22, %v1238_v43  ;;  %v651_v23 = vmul.f32 %v1206_v22, %v1245_v47 }
  0x56   : > { %v652_v30 = vmul.f32 %v1206_v22, %v1247_v48  ;;  %v653_v61 = vmul.f32 %v1206_v22, %v1249_v49  ;;  %v654_v14 = vmul.f32 %v1206_v22, %v1251_v50  ;;  %v655_v62 = vmul.f32 %v1206_v22, %v1253_v51 }
  0x57   : > { %v656_v63 = vmul.f32 %v1206_v22, %v1255_v52  ;;  %v673_v10 = vrot.slane %v641_v57, 2  ;;  %v674_v19 = vrot.slane %v642_v15, 2  ;;  %v676_v12 = vrot.slane %v643_v3, 2 }
  0x58   : > { %v677_v5 = vrot.slane %v644_v11, 2  ;;  %v679_v7 = vrot.slane %v645_v4, 2  ;;  %v680_v54 = vrot.slane %v646_v6, 2  ;;  %v682_v38 = vrot.slane %v647_v37, 2 }
  0x59   : > { %v683_v27 = vrot.slane %v648_v28, 2  ;;  %v675_v45 = vsel %vm596_vm1, %v673_v10, %v674_v19  ;;  %v685_v25 = vrot.slane %v649_v29, 2  ;;  %v686_v58 = vrot.slane %v650_v18, 2 }
  0x5a   : > { %v678_v20 = vsel %vm596_vm1, %v676_v12, %v677_v5  ;;  %v681_v9 = vsel %vm596_vm1, %v679_v7, %v680_v54  ;;  %v688_v21 = vrot.slane %v651_v23, 2  ;;  %v689_v22 = vrot.slane %v652_v30, 2 }
  0x5b   : > { %v684_v0 = vsel %vm596_vm1, %v682_v38, %v683_v27  ;;  %v687_v2 = vsel %vm596_vm1, %v685_v25, %v686_v58  ;;  %v691_v16 = vrot.slane %v653_v61, 2  ;;  %v692_v59 = vrot.slane %v654_v14, 2  ;;  %v1012_v38 = vld [vmem:[%s1547_s2] ss:$0 sm:$0xff] }
  0x5c   : > { %v694_v60 = vrot.slane %v655_v62, 2  ;;  %v690_v31 = vsel %vm596_vm1, %v688_v21, %v689_v22  ;;  %v695_v44 = vrot.slane %v656_v63, 2  ;;  %v705_v17 = vadd.f32 %v675_v45, %v629_v32 }
  0x5d   : > { %v706_v57 = vadd.f32 %v678_v20, %v630_v39  ;;  %v693_v15 = vsel %vm596_vm1, %v691_v16, %v692_v59  ;;  %v707_v3 = vadd.f32 %v681_v9, %v631_v55  ;;  %v708_v11 = vadd.f32 %v684_v0, %v632_v56 }
  0x5e   : > { %v709_v4 = vadd.f32 %v687_v2, %v633_v26  ;;  %v696_v6 = vsel %vm596_vm1, %v694_v60, %v695_v44  ;;  %v710_v37 = vadd.f32 %v690_v31, %v634_v24  ;;  %v711_v28 = vadd.f32 %v693_v15, %v635_v13 }
  0x5f   : > { %v717_v29 = vmul.f32 %v1011_v1, %v1221_v33  ;;  %v712_v18 = vadd.f32 %v696_v6, %v636_v8  ;;  %v718_v23 = vmul.f32 %v1011_v1, %v1223_v34  ;;  %v719_v30 = vmul.f32 %v1011_v1, %v1225_v35 }
  0x60   : > { %v720_v61 = vmul.f32 %v1011_v1, %v1227_v36  ;;  %v721_v32 = vmul.f32 %v1011_v1, %v1232_v40  ;;  %v722_v39 = vmul.f32 %v1011_v1, %v1234_v41  ;;  %v723_v55 = vmul.f32 %v1011_v1, %v1236_v42 }
  0x61   : > { %v724_v56 = vmul.f32 %v1011_v1, %v1238_v43  ;;  %v725_v26 = vmul.f32 %v1011_v1, %v1245_v47  ;;  %v726_v24 = vmul.f32 %v1011_v1, %v1247_v48  ;;  %v727_v33 = vmul.f32 %v1011_v1, %v1249_v49 }
  0x62   : > { %v728_v34 = vmul.f32 %v1011_v1, %v1251_v50  ;;  %v729_v35 = vmul.f32 %v1011_v1, %v1253_v51  ;;  %v730_v36 = vmul.f32 %v1011_v1, %v1255_v52  ;;  %v731_v40 = vmul.f32 %v1011_v1, %v1257_v53 }
  0x63   : > { %v1553_v41 = vunpack.c.l.bf16 %v1243_v46  ;;  %v749_v42 = vrot.slane %v717_v29, 2  ;;  %v750_v8 = vrot.slane %v718_v23, 2  ;;  %v752_v43 = vrot.slane %v719_v30, 2 }
  0x64   : > { %v753_v14 = vrot.slane %v720_v61, 2  ;;  %v755_v47 = vrot.slane %v721_v32, 2  ;;  %v756_v62 = vrot.slane %v722_v39, 2  ;;  %v758_v48 = vrot.slane %v723_v55, 2 }
  0x65   : > { %v732_v13 = vmul.f32 %v1011_v1, %v1553_v41  ;;  %v759_v63 = vrot.slane %v724_v56, 2  ;;  %v751_v49 = vsel %vm596_vm1, %v749_v42, %v750_v8  ;;  %v761_v51 = vrot.slane %v725_v26, 2 }
  0x66   : > { %v754_v50 = vsel %vm596_vm1, %v752_v43, %v753_v14  ;;  %v762_v10 = vrot.slane %v726_v24, 2  ;;  %v757_v52 = vsel %vm596_vm1, %v755_v47, %v756_v62  ;;  %v764_v46 = vrot.slane %v727_v33, 2 }
  0x67   : > { %v760_v53 = vsel %vm596_vm1, %v758_v48, %v759_v63  ;;  %v765_v19 = vrot.slane %v728_v34, 2  ;;  %v767_v5 = vrot.slane %v729_v35, 2  ;;  %v768_v7 = vrot.slane %v730_v36, 2 }
  0x68   : > { %v763_v12 = vsel %vm596_vm1, %v761_v51, %v762_v10  ;;  %v770_v54 = vrot.slane %v731_v40, 2  ;;  %v771_v45 = vrot.slane %v732_v13, 2  ;;  %v781_v20 = vadd.f32 %v751_v49, %v705_v17 }
  0x69   : > { %v766_v27 = vsel %vm596_vm1, %v764_v46, %v765_v19  ;;  %v782_v25 = vadd.f32 %v754_v50, %v706_v57  ;;  %v769_v58 = vsel %vm596_vm1, %v767_v5, %v768_v7  ;;  %v783_v9 = vadd.f32 %v757_v52, %v707_v3 }
  0x6a   : > { %v784_v0 = vadd.f32 %v760_v53, %v708_v11  ;;  %v785_v21 = vadd.f32 %v763_v12, %v709_v4  ;;  %v772_v22 = vsel %vm596_vm1, %v770_v54, %v771_v45  ;;  %v786_v1 = vadd.f32 %v766_v27, %v710_v37 }
  0x6b   : > { %v787_v2 = vadd.f32 %v769_v58, %v711_v28  ;;  %v796_v16 = vadd.f32 %v1012_v38, %v781_v20  ;;  %v788_v59 = vadd.f32 %v772_v22, %v712_v18  ;;  %v797_v60 = vadd.f32 %v1012_v38, %v782_v25 }
  0x6c   : > { %v798_v31 = vadd.f32 %v1012_v38, %v783_v9  ;;  %v799_v44 = vadd.f32 %v1012_v38, %v784_v0  ;;  %v800_v15 = vadd.f32 %v1012_v38, %v785_v21  ;;  %v801_v6 = vadd.f32 %v1012_v38, %v786_v1 }
  0x6d   : > { %v1526_v29 = vadd.f32 %v1012_v38, %v787_v2  ;;  %v1013_v17 = vmul.f32 -1.442695, %v796_v16  ;;  %v803_v57 = vadd.f32 %v1012_v38, %v788_v59  ;;  %v1014_v23 = vmul.f32 -1.442695, %v797_v60  ;;  %v881_v59 = vld [vmem:[%s1182_s23] sm:$0x1] }
  0x6e   : > { %v1015_v30 = vmul.f32 -1.442695, %v798_v31  ;;  %v1016_v3 = vmul.f32 -1.442695, %v799_v44  ;;  %v1017_v11 = vmul.f32 -1.442695, %v800_v15 }
  0x6f   : > { %1073 = vpow2.f32 %v1013_v17  ;;  %v1018_v4 = vmul.f32 -1.442695, %v801_v6  ;;  %v1019_v37 = vmul.f32 -1.442695, %v1526_v29  ;;  %v1020_v28 = vmul.f32 -1.442695, %v803_v57 }
  0x70   : > { %1075 = vpow2.f32 %v1014_v23 }
  0x71   : > { %1077 = vpow2.f32 %v1015_v30 }
  0x72   : > { %1079 = vpow2.f32 %v1016_v3 }
  0x73   : > { %1081 = vpow2.f32 %v1017_v11 }
  0x74   : > { %1083 = vpow2.f32 %v1018_v4 }
  0x75   : > { %1085 = vpow2.f32 %v1019_v37 }
  0x76   : > { %1087 = vpow2.f32 %v1020_v28 }
  0x7c   : > { %v1074_v18 = vpop.eup %1073 }
  0x7d   : > { %v1076_v61 = vpop.eup %1075  ;;  %v828_v32 = vadd.f32 1.0, %v1074_v18 }
  0x7e   : > { %v1078_v39 = vpop.eup %1077  ;;  %v829_v55 = vadd.f32 1.0, %v1076_v61 }
  0x7f   : > { %v1080_v56 = vpop.eup %1079  ;;  %v830_v26 = vadd.f32 1.0, %v1078_v39  ;;  %1089 = vrcp.f32 %v828_v32 }
  0x80   : > { %v1082_v24 = vpop.eup %1081  ;;  %v831_v33 = vadd.f32 1.0, %v1080_v56  ;;  %1091 = vrcp.f32 %v829_v55 }
  0x81   : > { %v1084_v34 = vpop.eup %1083  ;;  %v832_v35 = vadd.f32 1.0, %v1082_v24  ;;  %1093 = vrcp.f32 %v830_v26 }
  0x82   : > { %v1086_v36 = vpop.eup %1085  ;;  %v833_v40 = vadd.f32 1.0, %v1084_v34  ;;  %1095 = vrcp.f32 %v831_v33 }
  0x83   : > { %v1088_v41 = vpop.eup %1087  ;;  %v834_v13 = vadd.f32 1.0, %v1086_v36  ;;  %1097 = vrcp.f32 %v832_v35 }
  0x84   : > { %v835_v42 = vadd.f32 1.0, %v1088_v41  ;;  %1099 = vrcp.f32 %v833_v40 }
  0x85   : > { %1101 = vrcp.f32 %v834_v13 }
  0x86   : > { %1103 = vrcp.f32 %v835_v42 }
  0x8c   : > { %v1090_v8 = vpop.eup %1089 }
  0x8d   : > { %v1092_v43 = vpop.eup %1091  ;;  %v852_v14 = vmul.f32 %v1090_v8, %v796_v16 }
  0x8e   : > { %v1094_v47 = vpop.eup %1093  ;;  %v853_v62 = vmul.f32 %v1092_v43, %v797_v60 }
  0x8f   : > { %v1096_v48 = vpop.eup %1095  ;;  %v854_v63 = vmul.f32 %v1094_v47, %v798_v31 }
  0x90   : > { %v1098_v49 = vpop.eup %1097  ;;  %v855_v50 = vmul.f32 %v1096_v48, %v799_v44  ;;  %v1027_v51 = vpack.c.bf16 %v853_v62, %v852_v14  ;;  %v882_v10 = vadd.f32 %v853_v62, %v852_v14 }
  0x91   : > { %v1100_v52 = vpop.eup %1099  ;;  %v856_v46 = vmul.f32 %v1098_v49, %v800_v15 }
  0x92   : > { %v1102_v53 = vpop.eup %1101  ;;  %v857_v19 = vmul.f32 %v1100_v52, %v801_v6  ;;  %1028 = vst [vmem:[%s232_s9] sm:$0xff] %v1027_v51   ;;  %v1032_v12 = vpack.c.bf16 %v855_v50, %v854_v63  ;;  %v883_v5 = vadd.f32 %v882_v10, %v854_v63 }
  0x93   : > { %v1104_v7 = vpop.eup %1103  ;;  %v858_v54 = vmul.f32 %v1102_v53, %v1526_v29 }
  0x94   : > { %v859_v38 = vmul.f32 %v1104_v7, %v803_v57  ;;  %1044 = vst [vmem:[%s232_s9 + $0x8] sm:$0xff] %v1032_v12   ;;  %v1037_v27 = vpack.c.bf16 %v857_v19, %v856_v46  ;;  %v884_v45 = vadd.f32 %v883_v5, %v855_v50 }
  0x96   : > { %1045 = vst [vmem:[%s232_s9 + $0x10] sm:$0xff] %v1037_v27   ;;  %v1042_v20 = vpack.c.bf16 %v859_v38, %v858_v54  ;;  %v885_v25 = vadd.f32 %v884_v45, %v856_v46 }
  0x98   : > { %1046 = vst [vmem:[%s232_s9 + $0x18] sm:$0xff] %v1042_v20   ;;  %v886_v58 = vadd.f32 %v885_v25, %v857_v19 }
  0x9a   : > { %v887_v9 = vadd.f32 %v886_v58, %v858_v54 }
  0x9c   : > { %v888_v0 = vadd.f32 %v887_v9, %v859_v38 }
  0x9e   : > { %v889_v21 = vrot.slane %v888_v0, 4 }
  0xa0   : > { %v890_v22 = vadd.f32 %v889_v21, %v888_v0 }
  0xa2   : > { %v891_v1 = vrot.slane %v890_v22, 2 }
  0xa4   : > { %v892_v2 = vadd.f32 %v891_v1, %v890_v22 }
  0xa6   : > { %v893_v16 = vrot.slane %v892_v2, 1 }
  0xa8   : > { %v894_v60 = vadd.f32 %v893_v16, %v892_v2 }
  0xaa   : > { %v895_v31 = vadd.f32 %v894_v60, %v881_v59 }
  0xac   : > { %896 = vst [vmem:[%s1182_s23] sm:$0x1] %v895_v31 }
  0xad PF: > { %s15_s17 = sadd.s32 1, %s1127_s17   ;;  %s1554_s15 = smov %s1123_s16 }
  0xae   : > { %p12_p5 = scmp.ge.s32.totalorder %s15_s17, 4   ;;  %s1555_s16 = smov %s1557_s18 }
  0xb0   :  { %14 = sbr.rel (!%p12_p5) target bundleno = 2 (0x2), region = 78 }

// kernel: efficientnet_features.4
= control target key start
LH: loop header
LB: loop body
LE: loop exit
PB: predicated region body
PF: predicated region fallthrough
CT: control target
= control target key end

     0   :  { %vm105_vm0 = vcmask 261120   ;;  %s1656_s1 = inlined_call_operand.vmem [shape: bf16[32,32], index: 1, kind: input, shape index: {}]   ;;  %s1657_s0 = inlined_call_operand.vmem [shape: bf16[128,32], index: 0, kind: input, shape index: {}]   ;;  %s1658_s3 = inlined_call_operand.vmem [shape: bf16[32,128], index: 3, kind: input, shape index: {}]   ;;  %s1659_s5 = inlined_call_operand.vmem [shape: bf16[32,128], index: 5, kind: input, shape index: {}]   ;;  %s1660_s2 = inlined_call_operand.vmem [shape: f32[1,32], index: 2, kind: input, shape index: {}]   ;;  %s1661_s4 = inlined_call_operand.vmem [shape: f32[1,128], index: 4, kind: input, shape index: {}]   ;;  %s1662_s7 = inlined_call_operand.vmem [shape: bf16[128,128], index: 7, kind: output, shape index: {1}]   ;;  %s1663_s6 = inlined_call_operand.vmem [shape: bf16[128,128], index: 6, kind: output, shape index: {0}]  }
   0x1   :  { %v1208_v0 = vld [vmem:[%s1656_s1 + $0x8] sm:$0xff]   ;;  %v1209_v1 = vld [vmem:[%s1656_s1] sm:$0xff]   ;;  %v1214_v6 = vld [vmem:[%s1657_s0 + $0x10] sm:$0xff]  }
   0x2   :  { %1144 = vmatprep.subr.bf16.mxu0 %v1208_v0  ;;  %1204 = vmatprep.subr.bf16.mxu1 %v1208_v0  ;;  %v1210_v2 = vld [vmem:[%s1657_s0] sm:$0xff]   ;;  %v1212_v4 = vld [vmem:[%s1657_s0 + $0x8] sm:$0xff]   ;;  %v1215_v7 = vld [vmem:[%s1657_s0 + $0x30] sm:$0xff]  }
   0x3   :  { %1145 = vmatpush3.bf16.msra.mxu0 %v1208_v0  ;;  %1206 = vmatpush3.bf16.msra.mxu1 %v1208_v0  ;;  %v1211_v3 = vld [vmem:[%s1657_s0 + $0x20] sm:$0xff]   ;;  %v1213_v5 = vld [vmem:[%s1657_s0 + $0x28] sm:$0xff]   ;;  %v1216_v8 = vld [vmem:[%s1657_s0 + $0x18] sm:$0xff]  }
   0x4   :  { %1146 = vmatprep.subr.bf16.mxu0 %v1209_v1  ;;  %1205 = vmatprep.subr.bf16.mxu1 %v1209_v1  ;;  %v1217_v9 = vld [vmem:[%s1657_s0 + $0x38] sm:$0xff]   ;;  %v1218_v10 = vld [vmem:[%s1658_s3 + $0x8] sm:$0xff]   ;;  %v1219_v12 = vld [vmem:[%s1658_s3] sm:$0xff]  }
   0x5   :  { %1148 = vmatprep.mubr.msk.bf16.mxu0 %vm105_vm0, %v1210_v2  ;;  %1156 = vmatprep.mubr.msk.bf16.mxu1 %vm105_vm0, %v1211_v3  ;;  %v1220_v11 = vld [vmem:[%s1659_s5 + $0x8] sm:$0xff]   ;;  %v1221_v13 = vld [vmem:[%s1659_s5] sm:$0xff]  }
   0x6   :  { %v884_v14 = vld [vmem:[%s1660_s2] ss:$0 sm:$0xff] }
   0x7   :  { %1147 = vmatpush3.bf16.msra.mxu0 %v1209_v1  ;;  %1207 = vmatpush3.bf16.msra.mxu1 %v1209_v1 }
   0x8   :  { %1164 = vmatprep.subr.bf16.mxu1 %v1218_v10  ;;  %1184 = vmatprep.subr.bf16.mxu0 %v1220_v11 }
   0xa   :  { %1149 = vmatmul.mubr.msk.bf16.vlgmr.msra.gmra.mxu0 %vm105_vm0, %v1212_v4  ;;  %1157 = vmatmul.mubr.msk.bf16.vlgmr.msra.gmra.mxu1 %vm105_vm0, %v1213_v5 }
   0xb   :  { %1152 = vmatprep.mubr.msk.bf16.mxu0 %vm105_vm0, %v1214_v6  ;;  %1160 = vmatprep.mubr.msk.bf16.mxu1 %vm105_vm0, %v1215_v7 }
   0xc   :  { %1165 = vmatpush3.bf16.msra.mxu1 %v1218_v10  ;;  %1185 = vmatpush3.bf16.msra.mxu0 %v1220_v11 }
   0xd   :  { %1166 = vmatprep.subr.bf16.mxu1 %v1219_v12  ;;  %1186 = vmatprep.subr.bf16.mxu0 %v1221_v13 }
  0x10   :  { %1167 = vmatpush3.bf16.msra.mxu1 %v1219_v12  ;;  %1187 = vmatpush3.bf16.msra.mxu0 %v1221_v13 }
  0x12   :  { %1153 = vmatmul.mubr.msk.bf16.gmra.mxu0 %vm105_vm0, %v1216_v8  ;;  %1161 = vmatmul.mubr.msk.bf16.gmra.mxu1 %vm105_vm0, %v1217_v9 }
  0xca   :  { %v1150_v15 = vpop.f32.mrf.mxu0  ;;  %v1158_v16 = vpop.f32.mrf.mxu1 }
  0xcb   :  { %v1443_v17 = vadd.f32 %v1150_v15, %v884_v14  ;;  %v1471_v47 = vadd.f32 %v1158_v16, %v884_v14 }
  0xcc   :  { %v164_v18 = vpop.f32.mrf.mxu0  ;;  %v196_v19 = vpop.f32.mrf.mxu1 }
  0xcd   :  { %v905_v20 = vmul.f32 -1.442695, %v1443_v17  ;;  %v1446_v21 = vadd.f32 %v884_v14, %v164_v18  ;;  %v1448_v22 = vadd.f32 %v884_v14, %v196_v19  ;;  %v913_v57 = vmul.f32 -1.442695, %v1471_v47 }
  0xce   :  { %v1151_v23 = vpop.f32.mrf.mxu0  ;;  %v1159_v24 = vpop.f32.mrf.mxu1 }
  0xcf   :  { %v903_v25 = vmul.f32 -1.442695, %v1446_v21  ;;  %v1451_v26 = vadd.f32 %v1151_v23, %v884_v14  ;;  %1222 = vpow2.f32 %v905_v20  ;;  %v911_v27 = vmul.f32 -1.442695, %v1448_v22 }
  0xd0   :  { %v167_v28 = vpop.f32.mrf.mxu0  ;;  %v199_v29 = vpop.f32.mrf.mxu1  ;;  %v1466_v42 = vadd.f32 %v1159_v24, %v884_v14 }
  0xd1   :  { %1224 = vpow2.f32 %v903_v25  ;;  %v906_v30 = vmul.f32 -1.442695, %v1451_v26  ;;  %v1455_v31 = vadd.f32 %v884_v14, %v167_v28  ;;  %v1457_v32 = vadd.f32 %v884_v14, %v199_v29 }
  0xd2   :  { %v1154_v33 = vpop.f32.mrf.mxu0  ;;  %v1162_v34 = vpop.f32.mrf.mxu1  ;;  %v914_v54 = vmul.f32 -1.442695, %v1466_v42 }
  0xd3   :  { %1226 = vpow2.f32 %v906_v30  ;;  %v904_v35 = vmul.f32 -1.442695, %v1455_v31  ;;  %v912_v36 = vmul.f32 -1.442695, %v1457_v32  ;;  %v1461_v37 = vadd.f32 %v1154_v33, %v884_v14 }
  0xd4   :  { %1228 = vpow2.f32 %v911_v27  ;;  %v180_v38 = vpop.f32.mrf.mxu0  ;;  %v212_v39 = vpop.f32.mrf.mxu1  ;;  %v1487_v63 = vadd.f32 %v1162_v34, %v884_v14 }
  0xd5   :  { %1230 = vpow2.f32 %v904_v35  ;;  %v909_v40 = vmul.f32 -1.442695, %v1461_v37  ;;  %v1464_v41 = vadd.f32 %v884_v14, %v180_v38  ;;  %v1473_v48 = vadd.f32 %v884_v14, %v212_v39 }
  0xd6   :  { %1232 = vpow2.f32 %v912_v36  ;;  %v1155_v43 = vpop.f32.mrf.mxu0  ;;  %v1163_v44 = vpop.f32.mrf.mxu1  ;;  %v917_v8 = vmul.f32 -1.442695, %v1487_v63 }
  0xd7   :  { %v907_v45 = vmul.f32 -1.442695, %v1464_v41  ;;  %v1469_v46 = vadd.f32 %v1155_v43, %v884_v14  ;;  %1234 = vpow2.f32 %v909_v40  ;;  %v915_v59 = vmul.f32 -1.442695, %v1473_v48 }
  0xd8   :  { %v183_v49 = vpop.f32.mrf.mxu0  ;;  %v215_v50 = vpop.f32.mrf.mxu1  ;;  %v1485_v61 = vadd.f32 %v1163_v44, %v884_v14 }
  0xd9   :  { %1236 = vpow2.f32 %v907_v45  ;;  %v910_v51 = vmul.f32 -1.442695, %v1469_v46  ;;  %v1476_v52 = vadd.f32 %v884_v14, %v183_v49  ;;  %v1478_v53 = vadd.f32 %v884_v14, %v215_v50 }
  0xda   :  { %v918_v5 = vmul.f32 -1.442695, %v1485_v61 }
  0xdb   :  { %1238 = vpow2.f32 %v910_v51  ;;  %v908_v55 = vmul.f32 -1.442695, %v1476_v52  ;;  %v916_v56 = vmul.f32 -1.442695, %v1478_v53 }
  0xdc   :  { %v1223_v58 = vpop.eup %1222 }
  0xdd   :  { %1240 = vpow2.f32 %v908_v55  ;;  %v277_v1 = vadd.f32 1.0, %v1223_v58 }
  0xde   :  { %v1225_v60 = vpop.eup %1224  ;;  %1242 = vpow2.f32 %v914_v54 }
  0xdf   :  { %v275_v62 = vadd.f32 1.0, %v1225_v60  ;;  %1244 = vpow2.f32 %v916_v56 }
  0xe0   :  { %v1227_v0 = vpop.eup %1226  ;;  %1246 = vpow2.f32 %v913_v57 }
  0xe1   :  { %v1229_v2 = vpop.eup %1228  ;;  %v278_v3 = vadd.f32 1.0, %v1227_v0  ;;  %1248 = vpow2.f32 %v915_v59 }
  0xe2   :  { %v1231_v4 = vpop.eup %1230  ;;  %1250 = vrcp.f32 %v275_v62  ;;  %v283_v9 = vadd.f32 1.0, %v1229_v2 }
  0xe3   :  { %v1233_v6 = vpop.eup %1232  ;;  %1252 = vrcp.f32 %v278_v3  ;;  %v276_v7 = vadd.f32 1.0, %v1231_v4 }
  0xe4   :  { %1254 = vrcp.f32 %v277_v1  ;;  %v1235_v10 = vpop.eup %1234  ;;  %v284_v11 = vadd.f32 1.0, %v1233_v6 }
  0xe5   :  { %1256 = vrcp.f32 %v276_v7  ;;  %v281_v15 = vadd.f32 1.0, %v1235_v10 }
  0xe6   :  { %v1237_v12 = vpop.eup %1236  ;;  %1258 = vpow2.f32 %v918_v5 }
  0xe7   :  { %1260 = vpow2.f32 %v917_v8  ;;  %v279_v13 = vadd.f32 1.0, %v1237_v12 }
  0xe8   :  { %v1239_v14 = vpop.eup %1238  ;;  %1262 = vrcp.f32 %v283_v9 }
  0xe9   :  { %1264 = vrcp.f32 %v284_v11  ;;  %v282_v16 = vadd.f32 1.0, %v1239_v14 }
  0xea   :  { %v1241_v18 = vpop.eup %1240  ;;  %1266 = vrcp.f32 %v279_v13 }
  0xeb   :  { %v1243_v19 = vpop.eup %1242  ;;  %1268 = vrcp.f32 %v282_v16  ;;  %v280_v20 = vadd.f32 1.0, %v1241_v18 }
  0xec   :  { %v1245_v23 = vpop.eup %1244  ;;  %1270 = vrcp.f32 %v281_v15  ;;  %v286_v27 = vadd.f32 1.0, %v1243_v19 }
  0xed   :  { %v1247_v24 = vpop.eup %1246  ;;  %1272 = vrcp.f32 %v280_v20  ;;  %v288_v29 = vadd.f32 1.0, %v1245_v23 }
  0xee   :  { %v1249_v25 = vpop.eup %1248  ;;  %v285_v33 = vadd.f32 1.0, %v1247_v24  ;;  %1274 = vrcp.f32 %v286_v27 }
  0xef   :  { %v1251_v28 = vpop.eup %1250  ;;  %v287_v35 = vadd.f32 1.0, %v1249_v25  ;;  %1276 = vrcp.f32 %v288_v29 }
  0xf0   :  { %v1253_v30 = vpop.eup %1252  ;;  %v323_v40 = vmul.f32 %v1251_v28, %v1446_v21  ;;  %1278 = vrcp.f32 %v285_v33 }
  0xf1   :  { %v1255_v34 = vpop.eup %1254  ;;  %v326_v38 = vmul.f32 %v1253_v30, %v1451_v26  ;;  %1280 = vrcp.f32 %v287_v35 }
  0xf2   :  { %v1257_v36 = vpop.eup %1256  ;;  %v325_v45 = vmul.f32 %v1255_v34, %v1443_v17 }
  0xf3   :  { %v1259_v39 = vpop.eup %1258  ;;  %v324_v43 = vmul.f32 %v1257_v36, %v1455_v31 }
  0xf4   :  { %v1261_v44 = vpop.eup %1260  ;;  %v340_v54 = vpack.c.bf16 %v326_v38, %v325_v45  ;;  %v290_v55 = vadd.f32 1.0, %v1259_v39 }
  0xf5   :  { %v1263_v49 = vpop.eup %1262  ;;  %v339_v50 = vpack.c.bf16 %v324_v43, %v323_v40  ;;  %v289_v21 = vadd.f32 1.0, %v1261_v44 }
  0xf6   :  { %v1265_v51 = vpop.eup %1264  ;;  %1282 = vrcp.f32 %v290_v55  ;;  %v331_v0 = vmul.f32 %v1263_v49, %v1448_v22 }
  0xf7   :  { %v1267_v56 = vpop.eup %1266  ;;  %1168 = vmatprep.mubr.msk.bf16.mxu1 %vm105_vm0, %v339_v50  ;;  %1188 = vmatprep.mubr.msk.bf16.mxu0 %vm105_vm0, %v339_v50  ;;  %v332_v58 = vmul.f32 %v1265_v51, %v1457_v32  ;;  %1284 = vrcp.f32 %v289_v21 }
  0xf8   :  { %v1269_v26 = vpop.eup %1268  ;;  %1169 = vmatmul.mubr.msk.bf16.vlgmr.msra.gmra.mxu1 %vm105_vm0, %v340_v54  ;;  %1189 = vmatmul.mubr.msk.bf16.vlgmr.msra.gmra.mxu0 %vm105_vm0, %v340_v54  ;;  %v327_v59 = vmul.f32 %v1267_v56, %v1464_v41 }
  0xf9   :  { %v1271_v31 = vpop.eup %1270  ;;  %v330_v57 = vmul.f32 %v1269_v26, %v1469_v46  ;;  %v343_v4 = vpack.c.bf16 %v332_v58, %v331_v0 }
  0xfa   :  { %v1273_v17 = vpop.eup %1272  ;;  %v329_v62 = vmul.f32 %v1271_v31, %v1461_v37 }
  0xfb   :  { %v328_v60 = vmul.f32 %v1273_v17, %v1476_v52  ;;  %v1275_v3 = vpop.eup %1274 }
  0xfc   :  { %v342_v2 = vpack.c.bf16 %v330_v57, %v329_v62  ;;  %v1277_v46 = vpop.eup %1276  ;;  %v334_v22 = vmul.f32 %v1275_v3, %v1466_v42 }
  0xfd   :  { %v341_v1 = vpack.c.bf16 %v328_v60, %v327_v59  ;;  %v1279_v32 = vpop.eup %1278  ;;  %v336_v41 = vmul.f32 %v1277_v46, %v1478_v53 }
  0xfe   :  { %v1281_v37 = vpop.eup %1280  ;;  %v333_v52 = vmul.f32 %v1279_v32, %v1471_v47  ;;  %v1526_v47 = vld [vmem:[%s1661_s4] ss:$0 sm:$0xff] }
  0xff   :  { %1172 = vmatprep.mubr.msk.bf16.mxu1 %vm105_vm0, %v341_v1  ;;  %1192 = vmatprep.mubr.msk.bf16.mxu0 %vm105_vm0, %v341_v1  ;;  %v335_v5 = vmul.f32 %v1281_v37, %v1473_v48 }
 0x100   :  { %1173 = vmatmul.mubr.msk.bf16.gmra.mxu1 %vm105_vm0, %v342_v2  ;;  %1193 = vmatmul.mubr.msk.bf16.gmra.mxu0 %vm105_vm0, %v342_v2  ;;  %v344_v6 = vpack.c.bf16 %v334_v22, %v333_v52 }
 0x101   :  { %1176 = vmatprep.mubr.msk.bf16.mxu1 %vm105_vm0, %v343_v4  ;;  %1196 = vmatprep.mubr.msk.bf16.mxu0 %vm105_vm0, %v343_v4  ;;  %v345_v8 = vpack.c.bf16 %v336_v41, %v335_v5 }
 0x103   :  { %v1283_v7 = vpop.eup %1282 }
 0x104   :  { %v1285_v9 = vpop.eup %1284  ;;  %v338_v42 = vmul.f32 %v1283_v7, %v1485_v61 }
 0x105   :  { %v337_v53 = vmul.f32 %v1285_v9, %v1487_v63 }
 0x107   :  { %v346_v10 = vpack.c.bf16 %v338_v42, %v337_v53 }
 0x108   :  { %1177 = vmatmul.mubr.msk.bf16.gmra.mxu1 %vm105_vm0, %v344_v6  ;;  %1197 = vmatmul.mubr.msk.bf16.gmra.mxu0 %vm105_vm0, %v344_v6 }
 0x109   :  { %1180 = vmatprep.mubr.msk.bf16.mxu1 %vm105_vm0, %v345_v8  ;;  %1200 = vmatprep.mubr.msk.bf16.mxu0 %vm105_vm0, %v345_v8 }
 0x110   :  { %1181 = vmatmul.mubr.msk.bf16.gmra.mxu1 %vm105_vm0, %v346_v10  ;;  %1201 = vmatmul.mubr.msk.bf16.gmra.mxu0 %vm105_vm0, %v346_v10 }
 0x1b8   :  { %v1170_v48 = vpop.f32.mrf.mxu1  ;;  %v1190_v11 = vpop.f32.mrf.mxu0 }
 0x1b9   :  { %v1529_v12 = vadd.f32 %v1170_v48, %v1526_v47 }
 0x1ba   :  { %v428_v13 = vpop.f32.mrf.mxu1  ;;  %v733_v14 = vpop.f32.mrf.mxu0 }
 0x1bb   :  { %v932_v61 = vmul.f32 -1.442695, %v1529_v12  ;;  %v1533_v63 = vadd.f32 %v1526_v47, %v428_v13 }
 0x1bc   :  { %v1171_v15 = vpop.f32.mrf.mxu1  ;;  %v1191_v16 = vpop.f32.mrf.mxu0 }
 0x1bd   :  { %1286 = vpow2.f32 %v932_v61  ;;  %v930_v18 = vmul.f32 -1.442695, %v1533_v63  ;;  %v1537_v19 = vadd.f32 %v1171_v15, %v1526_v47  ;;  %v1068_v20 = vpack.c.bf16 %v1191_v16, %v1190_v11 }
 0x1be   :  { %v431_v23 = vpop.f32.mrf.mxu1  ;;  %v736_v24 = vpop.f32.mrf.mxu0 }
 0x1bf   :  { %1288 = vpow2.f32 %v930_v18  ;;  %v933_v25 = vmul.f32 -1.442695, %v1537_v19  ;;  %1107 = vst [vmem:[%s1662_s7 + $0x8] sm:$0xff] %v1068_v20   ;;  %v1544_v27 = vadd.f32 %v1526_v47, %v431_v23  ;;  %v1063_v28 = vpack.c.bf16 %v736_v24, %v733_v14 }
 0x1c0   :  { %v1174_v29 = vpop.f32.mrf.mxu1  ;;  %v1194_v30 = vpop.f32.mrf.mxu0 }
 0x1c1   :  { %1290 = vpow2.f32 %v933_v25  ;;  %v931_v33 = vmul.f32 -1.442695, %v1544_v27  ;;  %1064 = vst [vmem:[%s1662_s7] sm:$0xff] %v1063_v28   ;;  %v1551_v34 = vadd.f32 %v1174_v29, %v1526_v47 }
 0x1c2   :  { %v444_v35 = vpop.f32.mrf.mxu1  ;;  %v749_v36 = vpop.f32.mrf.mxu0 }
 0x1c3   :  { %1292 = vpow2.f32 %v931_v33  ;;  %v936_v38 = vmul.f32 -1.442695, %v1551_v34  ;;  %v1555_v39 = vadd.f32 %v1526_v47, %v444_v35 }
 0x1c4   :  { %v1175_v40 = vpop.f32.mrf.mxu1  ;;  %v1195_v43 = vpop.f32.mrf.mxu0 }
 0x1c5   :  { %1294 = vpow2.f32 %v936_v38  ;;  %v934_v44 = vmul.f32 -1.442695, %v1555_v39  ;;  %v1559_v45 = vadd.f32 %v1175_v40, %v1526_v47  ;;  %v1078_v49 = vpack.c.bf16 %v1195_v43, %v1194_v30 }
 0x1c6   :  { %v447_v50 = vpop.f32.mrf.mxu1  ;;  %v752_v51 = vpop.f32.mrf.mxu0 }
 0x1c7   :  { %1296 = vpow2.f32 %v934_v44  ;;  %v937_v54 = vmul.f32 -1.442695, %v1559_v45  ;;  %1109 = vst [vmem:[%s1662_s7 + $0x18] sm:$0xff] %v1078_v49   ;;  %v1566_v55 = vadd.f32 %v1526_v47, %v447_v50  ;;  %v1073_v56 = vpack.c.bf16 %v752_v51, %v749_v36 }
 0x1c8   :  { %v1178_v26 = vpop.f32.mrf.mxu1  ;;  %v1198_v21 = vpop.f32.mrf.mxu0 }
 0x1c9   :  { %1298 = vpow2.f32 %v937_v54  ;;  %v935_v31 = vmul.f32 -1.442695, %v1566_v55  ;;  %1108 = vst [vmem:[%s1662_s7 + $0x10] sm:$0xff] %v1073_v56   ;;  %v1573_v17 = vadd.f32 %v1178_v26, %v1526_v47 }
 0x1ca   :  { %v1287_v57 = vpop.eup %1286  ;;  %v460_v58 = vpop.f32.mrf.mxu1 }
 0x1cb   :  { %v765_v59 = vpop.f32.mrf.mxu0  ;;  %v541_v60 = vadd.f32 1.0, %v1287_v57  ;;  %1300 = vpow2.f32 %v935_v31  ;;  %v940_v62 = vmul.f32 -1.442695, %v1573_v17  ;;  %v1577_v0 = vadd.f32 %v1526_v47, %v460_v58 }
 0x1cc   :  { %v1289_v1 = vpop.eup %1288  ;;  %v1179_v2 = vpop.f32.mrf.mxu1 }
 0x1cd   :  { %v1199_v3 = vpop.f32.mrf.mxu0  ;;  %1302 = vrcp.f32 %v541_v60  ;;  %v539_v4 = vadd.f32 1.0, %v1289_v1  ;;  %v938_v46 = vmul.f32 -1.442695, %v1577_v0  ;;  %v1581_v32 = vadd.f32 %v1179_v2, %v1526_v47 }
 0x1ce   :  { %v1291_v37 = vpop.eup %1290  ;;  %1304 = vpow2.f32 %v940_v62  ;;  %v1088_v22 = vpack.c.bf16 %v1199_v3, %v1198_v21  ;;  %v463_v41 = vpop.f32.mrf.mxu1 }
 0x1cf   :  { %v768_v52 = vpop.f32.mrf.mxu0  ;;  %1306 = vrcp.f32 %v539_v4  ;;  %v542_v5 = vadd.f32 1.0, %v1291_v37  ;;  %v941_v6 = vmul.f32 -1.442695, %v1581_v32  ;;  %v1585_v7 = vadd.f32 %v1526_v47, %v463_v41 }
 0x1d0   :  { %v1293_v8 = vpop.eup %1292  ;;  %1308 = vpow2.f32 %v938_v46  ;;  %1111 = vst [vmem:[%s1662_s7 + $0x28] sm:$0xff] %v1088_v22   ;;  %v1083_v9 = vpack.c.bf16 %v768_v52, %v765_v59  ;;  %v1182_v42 = vpop.f32.mrf.mxu1 }
 0x1d1   :  { %v1202_v53 = vpop.f32.mrf.mxu0  ;;  %1310 = vrcp.f32 %v542_v5  ;;  %v540_v10 = vadd.f32 1.0, %v1293_v8  ;;  %v939_v48 = vmul.f32 -1.442695, %v1585_v7  ;;  %v1592_v11 = vadd.f32 %v1182_v42, %v1526_v47 }
 0x1d2   :  { %v1295_v13 = vpop.eup %1294  ;;  %1312 = vpow2.f32 %v941_v6  ;;  %1110 = vst [vmem:[%s1662_s7 + $0x20] sm:$0xff] %v1083_v9   ;;  %v476_v14 = vpop.f32.mrf.mxu1 }
 0x1d3   :  { %v781_v61 = vpop.f32.mrf.mxu0  ;;  %1314 = vrcp.f32 %v540_v10  ;;  %v545_v15 = vadd.f32 1.0, %v1295_v13  ;;  %v944_v16 = vmul.f32 -1.442695, %v1592_v11  ;;  %v1599_v18 = vadd.f32 %v1526_v47, %v476_v14 }
 0x1d4   :  { %v1297_v20 = vpop.eup %1296  ;;  %1316 = vpow2.f32 %v939_v48  ;;  %v1183_v23 = vpop.f32.mrf.mxu1 }
 0x1d5   :  { %v1203_v24 = vpop.f32.mrf.mxu0  ;;  %1318 = vrcp.f32 %v545_v15  ;;  %v543_v25 = vadd.f32 1.0, %v1297_v20  ;;  %v942_v28 = vmul.f32 -1.442695, %v1599_v18  ;;  %v1603_v29 = vadd.f32 %v1183_v23, %v1526_v47 }
 0x1d6   :  { %v1299_v30 = vpop.eup %1298  ;;  %1320 = vpow2.f32 %v944_v16  ;;  %v1098_v33 = vpack.c.bf16 %v1203_v24, %v1202_v53  ;;  %v479_v35 = vpop.f32.mrf.mxu1 }
 0x1d7   :  { %v784_v36 = vpop.f32.mrf.mxu0  ;;  %1322 = vrcp.f32 %v543_v25  ;;  %v546_v38 = vadd.f32 1.0, %v1299_v30  ;;  %v945_v40 = vmul.f32 -1.442695, %v1603_v29  ;;  %v1607_v43 = vadd.f32 %v1526_v47, %v479_v35 }
 0x1d8   :  { %v1301_v44 = vpop.eup %1300  ;;  %1324 = vpow2.f32 %v942_v28  ;;  %1113 = vst [vmem:[%s1662_s7 + $0x38] sm:$0xff] %v1098_v33   ;;  %v1093_v49 = vpack.c.bf16 %v784_v36, %v781_v61 }
 0x1d9   :  { %1326 = vrcp.f32 %v546_v38  ;;  %v544_v50 = vadd.f32 1.0, %v1301_v44  ;;  %v943_v51 = vmul.f32 -1.442695, %v1607_v43 }
 0x1da   :  { %v1303_v54 = vpop.eup %1302  ;;  %1328 = vpow2.f32 %v945_v40  ;;  %1112 = vst [vmem:[%s1662_s7 + $0x30] sm:$0xff] %v1093_v49  }
 0x1db   :  { %v1305_v56 = vpop.eup %1304  ;;  %1330 = vrcp.f32 %v544_v50  ;;  %v589_v59 = vmul.f32 %v1303_v54, %v1529_v12 }
 0x1dc   :  { %v1307_v47 = vpop.eup %1306  ;;  %v549_v26 = vadd.f32 1.0, %v1305_v56  ;;  %1332 = vpow2.f32 %v943_v51 }
 0x1dd   :  { %v1309_v21 = vpop.eup %1308  ;;  %v587_v3 = vmul.f32 %v1307_v47, %v1533_v63 }
 0x1de   :  { %v1311_v31 = vpop.eup %1310  ;;  %v547_v57 = vadd.f32 1.0, %v1309_v21  ;;  %1334 = vrcp.f32 %v549_v26 }
 0x1df   :  { %v1313_v58 = vpop.eup %1312  ;;  %v590_v60 = vmul.f32 %v1311_v31, %v1537_v19 }
 0x1e0   :  { %v1315_v62 = vpop.eup %1314  ;;  %v550_v1 = vadd.f32 1.0, %v1313_v58  ;;  %1336 = vrcp.f32 %v547_v57 }
 0x1e1   :  { %v1317_v2 = vpop.eup %1316  ;;  %v1028_v4 = vpack.c.bf16 %v590_v60, %v589_v59  ;;  %v588_v46 = vmul.f32 %v1315_v62, %v1544_v27 }
 0x1e2   :  { %v1319_v37 = vpop.eup %1318  ;;  %1338 = vrcp.f32 %v550_v1  ;;  %v548_v22 = vadd.f32 1.0, %v1317_v2 }
 0x1e3   :  { %v1321_v41 = vpop.eup %1320  ;;  %1100 = vst [vmem:[%s1663_s6 + $0x8] sm:$0xff] %v1028_v4   ;;  %v1023_v12 = vpack.c.bf16 %v588_v46, %v587_v3  ;;  %v593_v8 = vmul.f32 %v1319_v37, %v1551_v34 }
 0x1e4   :  { %v1323_v19 = vpop.eup %1322  ;;  %1340 = vrcp.f32 %v548_v22  ;;  %v553_v52 = vadd.f32 1.0, %v1321_v41 }
 0x1e5   :  { %v1325_v5 = vpop.eup %1324  ;;  %1024 = vst [vmem:[%s1663_s6] sm:$0xff] %v1023_v12   ;;  %v591_v48 = vmul.f32 %v1323_v19, %v1555_v39 }
 0x1e6   :  { %v1327_v63 = vpop.eup %1326  ;;  %v551_v27 = vadd.f32 1.0, %v1325_v5  ;;  %1342 = vrcp.f32 %v553_v52 }
 0x1e7   :  { %v1329_v6 = vpop.eup %1328  ;;  %v594_v9 = vmul.f32 %v1327_v63, %v1559_v45 }
 0x1e8   :  { %v1331_v42 = vpop.eup %1330  ;;  %v554_v53 = vadd.f32 1.0, %v1329_v6  ;;  %1344 = vrcp.f32 %v551_v27 }
 0x1e9   :  { %v1333_v10 = vpop.eup %1332  ;;  %v1038_v13 = vpack.c.bf16 %v594_v9, %v593_v8  ;;  %v592_v14 = vmul.f32 %v1331_v42, %v1566_v55 }
 0x1ea   :  { %1346 = vrcp.f32 %v554_v53  ;;  %v552_v61 = vadd.f32 1.0, %v1333_v10 }
 0x1eb   :  { %1102 = vst [vmem:[%s1663_s6 + $0x18] sm:$0xff] %v1038_v13   ;;  %v1033_v15 = vpack.c.bf16 %v592_v14, %v591_v48  ;;  %v1335_v34 = vpop.eup %1334 }
 0x1ec   :  { %1348 = vrcp.f32 %v552_v61  ;;  %v597_v39 = vmul.f32 %v1335_v34, %v1573_v17 }
 0x1ed   :  { %1101 = vst [vmem:[%s1663_s6 + $0x10] sm:$0xff] %v1033_v15   ;;  %v1337_v45 = vpop.eup %1336 }
 0x1ee   :  { %v595_v23 = vmul.f32 %v1337_v45, %v1577_v0 }
 0x1ef   :  { %v1339_v16 = vpop.eup %1338 }
 0x1f0   :  { %v598_v55 = vmul.f32 %v1339_v16, %v1581_v32 }
 0x1f1   :  { %v1341_v20 = vpop.eup %1340 }
 0x1f2   :  { %v1048_v24 = vpack.c.bf16 %v598_v55, %v597_v39  ;;  %v596_v25 = vmul.f32 %v1341_v20, %v1585_v7 }
 0x1f3   :  { %v1343_v30 = vpop.eup %1342 }
 0x1f4   :  { %1104 = vst [vmem:[%s1663_s6 + $0x28] sm:$0xff] %v1048_v24   ;;  %v1043_v28 = vpack.c.bf16 %v596_v25, %v595_v23  ;;  %v601_v32 = vmul.f32 %v1343_v30, %v1592_v11 }
 0x1f5   :  { %v1345_v33 = vpop.eup %1344 }
 0x1f6   :  { %1103 = vst [vmem:[%s1663_s6 + $0x20] sm:$0xff] %v1043_v28   ;;  %v599_v36 = vmul.f32 %v1345_v33, %v1599_v18 }
 0x1f7   :  { %v1347_v17 = vpop.eup %1346 }
 0x1f8   :  { %v602_v35 = vmul.f32 %v1347_v17, %v1603_v29 }
 0x1f9   :  { %v1349_v0 = vpop.eup %1348 }
 0x1fa   :  { %v1058_v7 = vpack.c.bf16 %v602_v35, %v601_v32  ;;  %v600_v38 = vmul.f32 %v1349_v0, %v1607_v43 }
 0x1fc   :  { %1106 = vst [vmem:[%s1663_s6 + $0x38] sm:$0xff] %v1058_v7   ;;  %v1053_v40 = vpack.c.bf16 %v600_v38, %v599_v36 }
 0x1fe   :  { %1105 = vst [vmem:[%s1663_s6 + $0x30] sm:$0xff] %v1053_v40  }

// kernel: efficientnet_features.7
= control target key start
LH: loop header
LB: loop body
LE: loop exit
PB: predicated region body
PF: predicated region fallthrough
CT: control target
= control target key end

     0   :  { %10 = vsyncpa [#allocation3], 0  ;;  %s1193_s0 = inlined_call_operand.vmem [shape: bf16[2,64,128], index: 0, kind: input, shape index: {}]   ;;  %s1194_s1 = inlined_call_operand.vmem [shape: f32[2,1,128], index: 1, kind: input, shape index: {}]   ;;  %s1195_s2 = inlined_call_operand.vmem [shape: bf16[2,64,128], index: 2, kind: input, shape index: {}]   ;;  %s1196_s3 = inlined_call_operand.vmem [shape: bf16[128,128], index: 3, kind: input, shape index: {}]   ;;  %s1197_s4 = inlined_call_operand.vmem [shape: f32[1,128], index: 4, kind: input, shape index: {}]   ;;  %s1198_s5 = inlined_call_operand.hbm [shape: f32[2,64,128], index: 5, kind: output, shape index: {}]  }
   0x1   :  { %12 = vsyncpa [#allocation3 + $0x1], 0  ;;  %s1020_s18 = smov 0   ;;  %s1022_s19 = smov 0  }
   0x2   :  { %s1024_s20 = smov 0   ;;  %s1026_s21 = smov 0  }
   0x3   :  { %s1028_s22 = smov 0   ;;  %s1030_s23 = smov 0  }
   0x4 LB: > { %s686_s24 = sadd.s32 4294967295, %s985_s23   ;;  %s687_s25 = sadd.s32 4294967294, %s985_s23   ;;  %s985_s23 = sphi %s1030_s23, %s18_s23   ;;  %s981_s22 = sphi %s1028_s22, %s1205_s22   ;;  %s977_s21 = sphi %s1026_s21, %s1204_s21   ;;  %s973_s20 = sphi %s1024_s20, %s1203_s20   ;;  %s969_s19 = sphi %s1022_s19, %s1202_s19   ;;  %s965_s18 = sphi %s1020_s18, %s1201_s18  }
   0x5   : > { %s30_s26 = sadd.s32 1, %s981_s22  ;;  %s163_s27 = sadd.s32 1, %s973_s20 }
   0x6   : > { %p32_p0 = scmp.ge.s32.totalorder %s30_s26, 2  ;;  %p173_p1 = scmp.ne.s32.totalorder %s973_s20, %s969_s19 }
   0x7   : > { %p174_p2 = scmp.eq.s32.totalorder %s686_s24, 1  ;;  %p179_p3 = scmp.ne.s32.totalorder %s969_s19, %s965_s18 }
   0x8   : > { %s1207_s26 = smov (%p32_p0, %s30_s26), 0  ;;  %p180_p5 = scmp.eq.s32.totalorder %s687_s25, 1 }
   0x9   : > { %p1060_p4 = por %p174_p2, %p173_p1  ;;  %s158_s29 = ssub.s32 %s981_s22, %s1207_s26 }
   0xa   : > { %p690_p6 = scmp.ge.s32.totalorder %s985_s23, 1  ;;  %p161_p7 = scmp.eq.s32.totalorder %s158_s29, 0 }
   0xb   : > { %p1067_p8 = por %p180_p5, %p179_p3  ;;  %p236_p9 = scmp.lt.s32.totalorder %s985_s23, 3 }
   0xc   : > { %s1073_s6 = scalar_select %p161_p7, %s973_s20, %s163_s27  }
   0xd   : > { %p237_p10 = pnand %p690_p6, %p236_p9 }
   0xe   : > { %p281_p11 = scmp.lt.s32.totalorder (!%p237_p10), %s977_s21, 1  ;;  %s721_s9 = sshll.u32 (!%p237_p10), %s977_s21, 10 }
   0xf   : > { %240 = sbr.rel (%p237_p10) target bundleno = 306 (0x132), region = 40  ;;  %s1142_s15 = scalar_lea.hbm (!%p237_p10), %s1198_s5, %s721_s9 }
  0x10   : > { %s987_s24 = smov (!%p237_p10), [#allocation2]  }
  0x14   : > { %v869_v0 = vld [vmem:[%s1196_s3 + $0x38] sm:$0xff]   ;;  %v870_v1 = vld [vmem:[%s1196_s3 + $0x30] sm:$0xff]   ;;  %s1083_s11 = scalar_select %p281_p11, %s977_s21, 1  ;;  %v871_v2 = vld [vmem:[%s1196_s3 + $0x28] sm:$0xff]  }
  0x15   : > { %772 = vmatprep.subr.bf16.mxu0 %v869_v0  ;;  %796 = vmatprep.subr.bf16.mxu1 %v869_v0  ;;  %v872_v3 = vld [vmem:[%s1196_s3 + $0x20] sm:$0xff]   ;;  %v873_v14 = vld [vmem:[%s1196_s3 + $0x18] sm:$0xff]   ;;  %v874_v18 = vld [vmem:[%s1196_s3 + $0x10] sm:$0xff]  }
  0x16   : > { %773 = vmatpush3.bf16.msra.mxu0 %v869_v0  ;;  %804 = vmatpush3.bf16.msra.mxu1 %v869_v0  ;;  %s719_s14 = sshll.u32 %s1083_s11, 5  ;;  %s292_s27 = scalar_lea.vmem %s1194_s1, %s1083_s11  ;;  %v875_v21 = vld [vmem:[%s1196_s3 + $0x8] sm:$0xff]   ;;  %v876_v26 = vld [vmem:[%s1196_s3] sm:$0xff]  }
  0x17   : > { %774 = vmatprep.subr.bf16.mxu0 %v870_v1  ;;  %797 = vmatprep.subr.bf16.mxu1 %v870_v1  ;;  %s1094_s17 = scalar_lea.vmem %s1193_s0, %s719_s14  ;;  %v696_v5 = vld [vmem:[%s292_s27] ss:$0 sm:$0xff]  ;;  %s301_s27 = scalar_lea.vmem %s1195_s2, %s719_s14 }
  0x18   : > { %v723_v4 = vld [vmem:[%s1094_s17] sm:$0xff]   ;;  %v755_v6 = vld [vmem:[%s1094_s17 + $0x10] sm:$0xff]   ;;  %v754_v19 = vld [vmem:[%s1094_s17 + $0x8] sm:$0xff]   ;;  %s277_s11 = sand.u32 1, %s969_s19  }
  0x19   : > { %v724_v7 = vunpack.c.l.bf16 %v723_v4  ;;  %v725_v8 = vunpack.c.h.bf16 %v723_v4  ;;  %v732_v9 = vunpack.c.l.bf16 %v755_v6  ;;  %v733_v10 = vunpack.c.h.bf16 %v755_v6  ;;  %v756_v20 = vld [vmem:[%s1094_s17 + $0x18] sm:$0xff]   ;;  %v757_v33 = vld [vmem:[%s301_s27 + $0x8] sm:$0xff]   ;;  %v739_v35 = vld [vmem:[%s301_s27] sm:$0xff]   ;;  %s691_s14 = sshll.u32 %s277_s11, 6  ;;  %s1148_s21 = scalar_lea.sflag [#allocation3], %s277_s11 }
  0x1a   : > { %775 = vmatpush3.bf16.msra.mxu0 %v870_v1  ;;  %805 = vmatpush3.bf16.msra.mxu1 %v870_v1  ;;  %v728_v22 = vunpack.c.l.bf16 %v754_v19  ;;  %v729_v23 = vunpack.c.h.bf16 %v754_v19  ;;  %v736_v24 = vunpack.c.l.bf16 %v756_v20  ;;  %v737_v25 = vunpack.c.h.bf16 %v756_v20  ;;  %v759_v34 = vld [vmem:[%s301_s27 + $0x18] sm:$0xff]   ;;  %v758_v36 = vld [vmem:[%s301_s27 + $0x10] sm:$0xff]   ;;  %v705_v42 = vld [vmem:[%s1197_s4] ss:$0 sm:$0xff]  ;;  %s279_s8 = scalar_lea.vmem [#allocation2], %s691_s14  ;;  %s913_s17 = sshll.u32 %s987_s24, 4  ;;  %s914_s17 = int_to_ptr.vmem [resolvable:$false] %s913_s17 }
  0x1b   : > { %776 = vmatprep.subr.bf16.mxu0 %v871_v2  ;;  %798 = vmatprep.subr.bf16.mxu1 %v871_v2  ;;  %v328_v11 = vmul.f32 %v724_v7, %v696_v5  ;;  %v329_v12 = vmul.f32 %v725_v8, %v696_v5  ;;  %v332_v13 = vmul.f32 %v732_v9, %v696_v5  ;;  %v744_v37 = vunpack.c.l.bf16 %v757_v33  ;;  %s580_s10 = sshll.u32 %s279_s8, 4  ;;  %s915_s25 = scalar_lea.vmem %s914_s17, 2048  ;;  %s1144_s10 = int_to_ptr.vmem [resolvable:$true] %s580_s10 }
  0x1c   : > { %v333_v15 = vmul.f32 %v733_v10, %v696_v5  ;;  %v330_v27 = vmul.f32 %v728_v22, %v696_v5  ;;  %v331_v28 = vmul.f32 %v729_v23, %v696_v5  ;;  %v334_v29 = vmul.f32 %v736_v24, %v696_v5  ;;  %s909_s16 = scalar_lea.vmem %s1144_s10, 1024  ;;  %p916_p1 = scmp.lt.s32.totalorder %s1144_s10, %s914_s17 }
  0x1d   : > { %v336_v16 = vpack.c.bf16 %v329_v12, %v328_v11  ;;  %v335_v30 = vmul.f32 %v737_v25, %v696_v5  ;;  %v752_v38 = vunpack.c.l.bf16 %v759_v34  ;;  %v740_v39 = vunpack.c.l.bf16 %v739_v35  ;;  %p910_p12 = scmp.ne.s32.totalorder %s1144_s10, %s909_s16  ;;  %p917_p2 = scmp.lt.s32.totalorder %s915_s25, %s909_s16 }
  0x1e   : > { %777 = vmatpush3.bf16.msra.mxu0 %v871_v2  ;;  %806 = vmatpush3.bf16.msra.mxu1 %v871_v2  ;;  %v338_v17 = vpack.c.bf16 %v333_v15, %v332_v13  ;;  %v337_v31 = vpack.c.bf16 %v331_v28, %v330_v27  ;;  %v748_v40 = vunpack.c.l.bf16 %v758_v36  ;;  %v745_v48 = vunpack.c.h.bf16 %v757_v33 }
  0x1f   : > { %778 = vmatprep.subr.bf16.mxu0 %v872_v3  ;;  %799 = vmatprep.subr.bf16.mxu1 %v872_v3  ;;  %v339_v32 = vpack.c.bf16 %v335_v30, %v334_v29  ;;  %v753_v49 = vunpack.c.h.bf16 %v759_v34  ;;  %v741_v50 = vunpack.c.h.bf16 %v739_v35  ;;  %v749_v57 = vunpack.c.h.bf16 %v758_v36  ;;  %p911_p13 = pnand %p910_p12, %p1060_p4  ;;  %p918_p3 = por %p917_p2, %p916_p1 }
  0x20   : > { %788 = vmatprep.mubr.bf16.mxu0 %v336_v16  ;;  %792 = vmatprep.mubr.bf16.mxu1 %v338_v17 }
  0x21   : > { %p912_p0 = pneg %p911_p13 }
  0x22   : > { %779 = vmatpush3.bf16.msra.mxu0 %v872_v3  ;;  %807 = vmatpush3.bf16.msra.mxu1 %v872_v3 }
  0x23   : > { %780 = vmatprep.subr.bf16.mxu0 %v873_v14  ;;  %800 = vmatprep.subr.bf16.mxu1 %v873_v14  ;;  %p919_p5 = pnand %p918_p3, %p912_p0 }
  0x26   : > { %781 = vmatpush3.bf16.msra.mxu0 %v873_v14  ;;  %808 = vmatpush3.bf16.msra.mxu1 %v873_v14 }
  0x27   : > { %782 = vmatprep.subr.bf16.mxu0 %v874_v18  ;;  %801 = vmatprep.subr.bf16.mxu1 %v874_v18 }
  0x2a   : > { %783 = vmatpush3.bf16.msra.mxu0 %v874_v18  ;;  %809 = vmatpush3.bf16.msra.mxu1 %v874_v18 }
  0x2b   : > { %784 = vmatprep.subr.bf16.mxu0 %v875_v21  ;;  %802 = vmatprep.subr.bf16.mxu1 %v875_v21 }
  0x2e   : > { %785 = vmatpush3.bf16.msra.mxu0 %v875_v21  ;;  %810 = vmatpush3.bf16.msra.mxu1 %v875_v21 }
  0x2f   : > { %786 = vmatprep.subr.bf16.mxu0 %v876_v26  ;;  %803 = vmatprep.subr.bf16.mxu1 %v876_v26 }
  0x32   : > { %787 = vmatpush3.bf16.msra.mxu0 %v876_v26  ;;  %811 = vmatpush3.bf16.msra.mxu1 %v876_v26 }
  0x35   : > { %789 = vmatmul.mubr.bf16.vlgmr.msra.gmra.mxu0 %v337_v31  ;;  %793 = vmatmul.mubr.bf16.vlgmr.msra.gmra.mxu1 %v339_v32 }
  0xf5   : > { %v790_v41 = vpop.f32.mrf.mxu0  ;;  %v794_v43 = vpop.f32.mrf.mxu1 }
  0xf6   : > { %v463_v44 = vadd.f32 %v790_v41, %v744_v37  ;;  %v479_v45 = vadd.f32 %v794_v43, %v752_v38 }
  0xf7   : > { %v454_v46 = vpop.f32.mrf.mxu0  ;;  %v470_v47 = vpop.f32.mrf.mxu1 }
  0xf8   : > { %v1127_v51 = vadd.f32 %v705_v42, %v463_v44  ;;  %v1129_v52 = vadd.f32 %v705_v42, %v479_v45  ;;  %v455_v53 = vadd.f32 %v740_v39, %v454_v46  ;;  %v471_v54 = vadd.f32 %v748_v40, %v470_v47 }
  0xf9   : > { %v791_v55 = vpop.f32.mrf.mxu0  ;;  %v795_v56 = vpop.f32.mrf.mxu1 }
  0xfa   : > { %v708_v58 = vmul.f32 -1.442695, %v1127_v51  ;;  %v712_v59 = vmul.f32 -1.442695, %v1129_v52  ;;  %v492_v60 = vadd.f32 %v705_v42, %v455_v53  ;;  %v496_v61 = vadd.f32 %v705_v42, %v471_v54 }
  0xfb   : > { %v466_v62 = vadd.f32 %v791_v55, %v745_v48  ;;  %v482_v63 = vadd.f32 %v795_v56, %v753_v49  ;;  %v457_v0 = vpop.f32.mrf.mxu0  ;;  %v473_v1 = vpop.f32.mrf.mxu1 }
  0xfc   : > { %877 = vpow2.f32 %v708_v58  ;;  %v706_v2 = vmul.f32 -1.442695, %v492_v60  ;;  %v710_v3 = vmul.f32 -1.442695, %v496_v61  ;;  %v458_v4 = vadd.f32 %v741_v50, %v457_v0 }
  0xfd   : > { %879 = vpow2.f32 %v712_v59  ;;  %v495_v5 = vadd.f32 %v705_v42, %v466_v62  ;;  %v499_v6 = vadd.f32 %v705_v42, %v482_v63  ;;  %v474_v7 = vadd.f32 %v749_v57, %v473_v1 }
  0xfe   : > { %881 = vpow2.f32 %v706_v2  ;;  %v493_v8 = vadd.f32 %v705_v42, %v458_v4 }
  0xff   : > { %883 = vpow2.f32 %v710_v3  ;;  %v709_v9 = vmul.f32 -1.442695, %v495_v5  ;;  %v713_v10 = vmul.f32 -1.442695, %v499_v6  ;;  %v497_v11 = vadd.f32 %v705_v42, %v474_v7 }
 0x100   : > { %v707_v12 = vmul.f32 -1.442695, %v493_v8 }
 0x101   : > { %885 = vpow2.f32 %v709_v9  ;;  %v711_v13 = vmul.f32 -1.442695, %v497_v11 }
 0x102   : > { %887 = vpow2.f32 %v713_v10 }
 0x103   : > { %889 = vpow2.f32 %v707_v12 }
 0x104   : > { %891 = vpow2.f32 %v711_v13 }
 0x109   : > { %v878_v14 = vpop.eup %877 }
 0x10a   : > { %v880_v15 = vpop.eup %879  ;;  %v526_v16 = vadd.f32 1.0, %v878_v14 }
 0x10b   : > { %v882_v17 = vpop.eup %881  ;;  %v530_v18 = vadd.f32 1.0, %v880_v15 }
 0x10c   : > { %v884_v19 = vpop.eup %883  ;;  %893 = vrcp.f32 %v526_v16  ;;  %v524_v20 = vadd.f32 1.0, %v882_v17 }
 0x10d   : > { %895 = vrcp.f32 %v530_v18  ;;  %v528_v21 = vadd.f32 1.0, %v884_v19 }
 0x10e   : > { %v886_v22 = vpop.eup %885  ;;  %897 = vrcp.f32 %v524_v20 }
 0x10f   : > { %v888_v23 = vpop.eup %887  ;;  %899 = vrcp.f32 %v528_v21  ;;  %v527_v24 = vadd.f32 1.0, %v886_v22 }
 0x110   : > { %v890_v25 = vpop.eup %889  ;;  %v531_v26 = vadd.f32 1.0, %v888_v23 }
 0x111   : > { %v892_v27 = vpop.eup %891  ;;  %901 = vrcp.f32 %v527_v24  ;;  %v525_v28 = vadd.f32 1.0, %v890_v25 }
 0x112   : > { %903 = vrcp.f32 %v531_v26  ;;  %v529_v29 = vadd.f32 1.0, %v892_v27 }
 0x113   : > { %905 = vrcp.f32 %v525_v28 }
 0x114   : > { %907 = vrcp.f32 %v529_v29 }
 0x119   : > { %v894_v30 = vpop.eup %893 }
 0x11a   : > { %v896_v31 = vpop.eup %895  ;;  %v550_v32 = vmul.f32 %v894_v30, %v1127_v51 }
 0x11b   : > { %v898_v33 = vpop.eup %897  ;;  %v554_v34 = vmul.f32 %v896_v31, %v1129_v52 }
 0x11c   : > { %v900_v35 = vpop.eup %899  ;;  %558 = vst [vmem:[%s279_s8 + $0x10] sm:$0xff] %v550_v32  ;;  %v548_v36 = vmul.f32 %v898_v33, %v492_v60 }
 0x11d   : > { %562 = vst [vmem:[%s279_s8 + $0x30] sm:$0xff] %v554_v34  ;;  %v552_v37 = vmul.f32 %v900_v35, %v496_v61 }
 0x11e   : > { %v902_v38 = vpop.eup %901  ;;  %556 = vst [vmem:[%s279_s8] sm:$0xff] %v548_v36 }
 0x11f   : > { %v904_v39 = vpop.eup %903  ;;  %560 = vst [vmem:[%s279_s8 + $0x20] sm:$0xff] %v552_v37  ;;  %v551_v40 = vmul.f32 %v902_v38, %v495_v5 }
 0x120   : > { %v906_v41 = vpop.eup %905  ;;  %v555_v42 = vmul.f32 %v904_v39, %v499_v6 }
 0x121   : > { %v908_v43 = vpop.eup %907  ;;  %559 = vst [vmem:[%s279_s8 + $0x18] sm:$0xff] %v551_v40  ;;  %v549_v44 = vmul.f32 %v906_v41, %v493_v8 }
 0x122   : > { %563 = vst [vmem:[%s279_s8 + $0x38] sm:$0xff] %v555_v42  ;;  %v553_v45 = vmul.f32 %v908_v43, %v497_v11 }
 0x123   : > { %557 = vst [vmem:[%s279_s8 + $0x8] sm:$0xff] %v549_v44 }
 0x124   : > { %561 = vst [vmem:[%s279_s8 + $0x28] sm:$0xff] %v553_v45 }
 0x125   : > { %922 = shalt.err (!%p919_p5)
}
 0x126   : > { %s923_s27 = scalar_lea.hbm %s1142_s15, 1024  ;;  %s927_s11 = scalar_lea.hbm %s1198_s5, 2048 }
 0x127   : > { %p924_p6 = scmp.ne.s32.totalorder %s1142_s15, %s923_s27  ;;  %p928_p10 = scmp.lt.s32.totalorder %s1142_s15, %s1198_s5 }
 0x128   : > { %p929_p11 = scmp.lt.s32.totalorder %s927_s11, %s923_s27 }
 0x129   : > { %p925_p7 = pnand %p924_p6, %p1060_p4 }
 0x12a   : > { %p930_p12 = por %p929_p11, %p928_p10 }
 0x12b   : > { %p926_p9 = pneg %p925_p7 }
 0x12d   : > { %p931_p13 = pnand %p930_p12, %p926_p9 }
 0x12f   : > { %934 = shalt.err (!%p931_p13)
}
 0x130   : > { %s988_s9 = smov 128   ;;  %s989_s12 = smov 8  }
 0x131   : > { %812 = dma.vmem_to_hbm [thread:$0]  (%p1060_p4), %s1144_s10, 1024, %s1142_s15, %s1148_s21, %s988_s9, %s988_s9, %s989_s12  }
 0x132 PF: > { %p818_p0 = scmp.ge.s32.totalorder %s985_s23, 2  ;;  %s595_s13 = sand.u32 1, %s965_s18  }
 0x133   : > { %s596_s16 = scalar_lea.sflag [#allocation3], %s595_s13 }
 0x134   : > { %p815_p1 = pnand %p818_p0, %p1067_p8 }
 0x136   : > { %p816_p2 = pneg %p815_p1 }
 0x138   : > { %960 = dma.done.wait (%p816_p2), %s596_s16, 1024  }
 0x139   : > { %962 = vsyncadd (%p816_p2), %s596_s16, 4294966272  ;;  %s18_s23 = sadd.s32 1, %s985_s23   ;;  %s1201_s18 = smov %s969_s19 }
 0x13a   : > { %p15_p3 = scmp.ge.s32.totalorder %s18_s23, 4   ;;  %s1202_s19 = smov %s973_s20 }
 0x13b   : > { %s1203_s20 = smov %s1073_s6  ;;  %s1204_s21 = smov %s981_s22 }
 0x13c   : > { %s1205_s22 = smov %s1207_s26  ;;  %17 = sbr.rel (!%p15_p3) target bundleno = 4 (0x4), region = 81 }
 0x141   :  { %601 = vsyncpa [#allocation3], 1 }
 0x142   :  { %603 = vsyncpa [#allocation3 + $0x1], 1 }

</bundles_post_ra>
